<compile_context>
chip_gen: v6e
topology: v6e:2x2x1
jax: 0.10.0
libtpu: 0.0.40
codegen_flags: <defaults>
</compile_context>

<pallas_src>
import jax
import jax.numpy as jnp
from jax import lax
from jax.experimental import pallas as pl
from jax.experimental.pallas import tpu as pltpu

LANE = 128
VMEM_LIMIT = 64 * 1024 * 1024


def _round_up(x, m):
    return (x + m - 1) // m * m


# ----------------------------------------------------------------------------
# Pallas kernels
# ----------------------------------------------------------------------------
def _deconv_concat_kernel(x_ref, skip_ref, wt_ref, bt_ref, perm_ref, o_ref):
    """ConvTranspose2d(k=2,s=2) fused with channel-concat of the skip tensor.

    One grid step consumes one low-res input row and produces the two
    corresponding high-res rows (2h, 2h+1) of x_cat.
    """
    x = x_ref[0, 0]                                   # (W, Cp_in)   bf16
    bias = bt_ref[0]                                  # (Ccat_p,)    f32
    for dy in range(2):
        acc = None
        for dx in range(2):
            t = jnp.dot(x, wt_ref[dy, dx],
                        preferred_element_type=jnp.float32)          # (W, Ccat_p)
            # scatter columns w -> 2*w+dx via a tiny permutation matmul
            t = jnp.dot(perm_ref[dx], t.astype(jnp.bfloat16),
                        preferred_element_type=jnp.float32)          # (W2, Ccat_p)
            acc = t if acc is None else acc + t
        row = acc + bias + skip_ref[0, dy].astype(jnp.float32)
        o_ref[0, dy] = row.astype(o_ref.dtype)


def _conv1_bn_relu_ident_kernel(xrow_ref, w1_ref, b1_ref, wid_ref, bid_ref,
                                h1_ref, id_ref, acc_ref, idacc_ref):
    """3x3 conv + folded BN + ReLU, and the 1x1 identity conv, per output row.

    Grid = (N, H2, 3); the last axis is the kernel-row (dy) reduction.
    """
    dy = pl.program_id(2)
    n_w = h1_ref.shape[2]                              # W2

    @pl.when(dy == 0)
    def _init():
        acc_ref[...] = jnp.zeros_like(acc_ref)

    row = xrow_ref[0, 0]                               # (W2+2, Ccat_p) bf16
    acc = acc_ref[...]
    for dx in range(3):
        acc = acc + jnp.dot(row[dx:dx + n_w, :], w1_ref[dy * 3 + dx],
                            preferred_element_type=jnp.float32)
    acc_ref[...] = acc

    @pl.when(dy == 1)                                  # centre row == actual row h
    def _ident():
        idacc_ref[...] = (jnp.dot(row[1:1 + n_w, :], wid_ref[...],
                                  preferred_element_type=jnp.float32)
                          + bid_ref[0])

    @pl.when(dy == pl.num_programs(2) - 1)
    def _finalize():
        h1_ref[0, 0] = jnp.maximum(acc_ref[...] + b1_ref[0], 0.0).astype(h1_ref.dtype)
        id_ref[0, 0] = idacc_ref[...].astype(id_ref.dtype)


def _conv2_bn_add_relu_kernel(hrow_ref, id_ref, w2_ref, b2_ref, o_ref, acc_ref):
    """3x3 conv + folded BN + identity add + ReLU, per output row."""
    dy = pl.program_id(2)
    n_w = o_ref.shape[2]                               # W2

    @pl.when(dy == 0)
    def _init():
        acc_ref[...] = jnp.zeros_like(acc_ref)

    row = hrow_ref[0, 0]                               # (W2+2, Cout_p) bf16
    acc = acc_ref[...]
    for dx in range(3):
        acc = acc + jnp.dot(row[dx:dx + n_w, :], w2_ref[dy * 3 + dx],
                            preferred_element_type=jnp.float32)
    acc_ref[...] = acc

    @pl.when(dy == pl.num_programs(2) - 1)
    def _finalize():
        res = acc_ref[...] + b2_ref[0] + id_ref[0, 0].astype(jnp.float32)
        o_ref[0, 0] = jnp.maximum(res, 0.0).astype(o_ref.dtype)


# ----------------------------------------------------------------------------
# Parameter preparation (BN folding, channel padding, bf16 cast)
# ----------------------------------------------------------------------------
def _prepare_params(p, cin, cout, eps=1e-5):
    bf16, f32 = jnp.bfloat16, jnp.float32
    chalf = cin // 2
    ccat = cin
    cp_in = _round_up(cin, LANE)
    ccat_p = _round_up(ccat, LANE)
    cout_p = _round_up(cout, LANE)

    # ConvTranspose2d weight (Cin, Chalf, 2, 2) -> per-tap (dy, dx, Cin, Chalf)
    wt = jnp.transpose(p["wt"], (2, 3, 0, 1))
    wt = jnp.pad(wt, ((0, 0), (0, 0), (0, cp_in - cin), (0, ccat_p - chalf))).astype(bf16)
    bt = jnp.pad(p["bt"], (0, ccat_p - chalf)).reshape(1, ccat_p).astype(f32)

    def fold(w_oihw, b, g, be, m, v):
        scale = g / jnp.sqrt(v + eps)
        taps = jnp.transpose(w_oihw, (2, 3, 1, 0)) * scale     # (3,3,Ci,Co)
        beff = (b - m) * scale + be
        return taps, beff

    w1_t, b1_eff = fold(p["w1"], p["b1"], p["g1"], p["be1"], p["m1"], p["v1"])
    w1_t = jnp.pad(w1_t, ((0, 0), (0, 0), (0, ccat_p - ccat), (0, cout_p - cout)))
    w1_t = w1_t.reshape(9, ccat_p, cout_p).astype(bf16)
    b1_eff = jnp.pad(b1_eff, (0, cout_p - cout)).reshape(1, cout_p).astype(f32)

    w2_t, b2_eff = fold(p["w2"], p["b2"], p["g2"], p["be2"], p["m2"], p["v2"])
    w2_t = jnp.pad(w2_t, ((0, 0), (0, 0), (0, cout_p - cout), (0, cout_p - cout)))
    w2_t = w2_t.reshape(9, cout_p, cout_p).astype(bf16)
    b2_eff = jnp.pad(b2_eff, (0, cout_p - cout)).reshape(1, cout_p).astype(f32)

    wid = jnp.transpose(p["wid"][:, :, 0, 0], (1, 0))          # (Ccat, Cout)
    wid = jnp.pad(wid, ((0, ccat_p - ccat), (0, cout_p - cout))).astype(bf16)
    bid = jnp.pad(p["bid"], (0, cout_p - cout)).reshape(1, cout_p).astype(f32)

    dims = (chalf, ccat, cp_in, ccat_p, cout_p)
    return dict(wt=wt, bt=bt, w1=w1_t, b1=b1_eff, w2=w2_t, b2=b2_eff,
                wid=wid, bid=bid, dims=dims)


# ----------------------------------------------------------------------------
# Forward pass (matches UpResConvolution.forward)
# ----------------------------------------------------------------------------
def up_res_convolution(x_nchw, skip_nchw, p):
    N, Cin, H, W = x_nchw.shape
    Cout = p["w1"].shape[0]
    H2, W2 = 2 * H, 2 * W
    bf16, f32 = jnp.bfloat16, jnp.float32

    pp = _prepare_params(p, Cin, Cout)
    Chalf, Ccat, Cp_in, Ccat_p, Cout_p = pp["dims"]

    # --- activations: NCHW -> NHWC, channel-pad to 128 lanes, bf16 ---
    x = jnp.transpose(x_nchw, (0, 2, 3, 1))
    x = jnp.pad(x, ((0, 0), (0, 0), (0, 0), (0, Cp_in - Cin))).astype(bf16)
    # skip channels live at [Chalf:Cin] of the concat layout
    skip = jnp.transpose(skip_nchw, (0, 2, 3, 1))
    skip = jnp.pad(skip, ((0, 0), (0, 0), (0, 0), (Chalf, Ccat_p - Ccat))).astype(bf16)

    # column-scatter matrices for the deconv: out[2w+dx] = in[w]
    cols = 2 * jnp.arange(W)
    perm = jnp.stack([jax.nn.one_hot(cols + dx, W2, dtype=bf16).T for dx in range(2)])

    cparams2 = pltpu.CompilerParams(
        dimension_semantics=("parallel", "parallel"),
        vmem_limit_bytes=VMEM_LIMIT)
    cparams3 = pltpu.CompilerParams(
        dimension_semantics=("parallel", "parallel", "arbitrary"),
        vmem_limit_bytes=VMEM_LIMIT)

    # ---- kernel 1: ConvTranspose2d(2,2,s=2) fused with channel concat ----
    x_cat = pl.pallas_call(
        _deconv_concat_kernel,
        out_shape=jax.ShapeDtypeStruct((N, H2, W2, Ccat_p), bf16),
        grid_spec=pltpu.PrefetchScalarGridSpec(
            num_scalar_prefetch=0,
            grid=(N, H),
            in_specs=[
                pl.BlockSpec((1, 1, W, Cp_in), lambda n, h: (n, h, 0, 0)),
                pl.BlockSpec((1, 2, W2, Ccat_p), lambda n, h: (n, h, 0, 0)),
                pl.BlockSpec((2, 2, Cp_in, Ccat_p), lambda n, h: (0, 0, 0, 0)),
                pl.BlockSpec((1, Ccat_p), lambda n, h: (0, 0)),
                pl.BlockSpec((2, W2, W), lambda n, h: (0, 0, 0)),
            ],
            out_specs=pl.BlockSpec((1, 2, W2, Ccat_p), lambda n, h: (n, h, 0, 0)),
        ),
        compiler_params=cparams2,
    )(x, skip, pp["wt"], pp["bt"], perm)

    # spatial zero-pad once: halo for the 3x3 convs (padding=1 semantics)
    x_cat_pad = jnp.pad(x_cat, ((0, 0), (1, 1), (1, 1), (0, 0)))

    # ---- kernel 2: conv1(3x3)+BN1+ReLU and the 1x1 identity conv ----
    h1, ident = pl.pallas_call(
        _conv1_bn_relu_ident_kernel,
        out_shape=(jax.ShapeDtypeStruct((N, H2, W2, Cout_p), bf16),
                   jax.ShapeDtypeStruct((N, H2, W2, Cout_p), bf16)),
        grid_spec=pltpu.PrefetchScalarGridSpec(
            num_scalar_prefetch=0,
            grid=(N, H2, 3),
            in_specs=[
                pl.BlockSpec((1, 1, W2 + 2, Ccat_p), lambda n, h, dy: (n, h + dy, 0, 0)),
                pl.BlockSpec((9, Ccat_p, Cout_p), lambda n, h, dy: (0, 0, 0)),
                pl.BlockSpec((1, Cout_p), lambda n, h, dy: (0, 0)),
                pl.BlockSpec((Ccat_p, Cout_p), lambda n, h, dy: (0, 0)),
                pl.BlockSpec((1, Cout_p), lambda n, h, dy: (0, 0)),
            ],
            out_specs=[
                pl.BlockSpec((1, 1, W2, Cout_p), lambda n, h, dy: (n, h, 0, 0)),
                pl.BlockSpec((1, 1, W2, Cout_p), lambda n, h, dy: (n, h, 0, 0)),
            ],
            scratch_shapes=[pltpu.VMEM((W2, Cout_p), f32),
                            pltpu.VMEM((W2, Cout_p), f32)],
        ),
        compiler_params=cparams3,
    )(x_cat_pad, pp["w1"], pp["b1"], pp["wid"], pp["bid"])

    h1_pad = jnp.pad(h1, ((0, 0), (1, 1), (1, 1), (0, 0)))

    # ---- kernel 3: conv2(3x3)+BN2 + identity add + ReLU ----
    out_p = pl.pallas_call(
        _conv2_bn_add_relu_kernel,
        out_shape=jax.ShapeDtypeStruct((N, H2, W2, Cout_p), f32),
        grid_spec=pltpu.PrefetchScalarGridSpec(
            num_scalar_prefetch=0,
            grid=(N, H2, 3),
            in_specs=[
                pl.BlockSpec((1, 1, W2 + 2, Cout_p), lambda n, h, dy: (n, h + dy, 0, 0)),
                pl.BlockSpec((1, 1, W2, Cout_p), lambda n, h, dy: (n, h, 0, 0)),
                pl.BlockSpec((9, Cout_p, Cout_p), lambda n, h, dy: (0, 0, 0)),
                pl.BlockSpec((1, Cout_p), lambda n, h, dy: (0, 0)),
            ],
            out_specs=pl.BlockSpec((1, 1, W2, Cout_p), lambda n, h, dy: (n, h, 0, 0)),
            scratch_shapes=[pltpu.VMEM((W2, Cout_p), f32)],
        ),
        compiler_params=cparams3,
    )(h1_pad, ident, pp["w2"], pp["b2"])

    out = out_p[..., :Cout]
    return jnp.transpose(out, (0, 3, 1, 2))            # back to NCHW


# ----------------------------------------------------------------------------
# Pure-JAX reference (independent path through lax conv ops, f32, NCHW)
# ----------------------------------------------------------------------------
def reference(x, skip, p, eps=1e-5):
    dn = ("NCHW", "OIHW", "NCHW")

    # transposed conv = lhs-dilated conv with flipped, transposed kernel
    w_flip = jnp.transpose(p["wt"], (1, 0, 2, 3))[:, :, ::-1, ::-1]
    y = lax.conv_general_dilated(x, w_flip, (1, 1), ((1, 1), (1, 1)),
                                 lhs_dilation=(2, 2), dimension_numbers=dn)
    y = y + p["bt"][None, :, None, None]

    xc = jnp.concatenate([y, skip], axis=1)

    def bn(t, g, b, m, v):
        return (t - m[None, :, None, None]) / jnp.sqrt(v + eps)[None, :, None, None] \
            * g[None, :, None, None] + b[None, :, None, None]

    h = lax.conv_general_dilated(xc, p["w1"], (1, 1), ((1, 1), (1, 1)),
                                 dimension_numbers=dn) + p["b1"][None, :, None, None]
    h = jax.nn.relu(bn(h, p["g1"], p["be1"], p["m1"], p["v1"]))
    h = lax.conv_general_dilated(h, p["w2"], (1, 1), ((1, 1), (1, 1)),
                                 dimension_numbers=dn) + p["b2"][None, :, None, None]
    h = bn(h, p["g2"], p["be2"], p["m2"], p["v2"])
    ident = lax.conv_general_dilated(xc, p["wid"], (1, 1), ((0, 0), (0, 0)),
                                     dimension_numbers=dn) + p["bid"][None, :, None, None]
    return jax.nn.relu(h + ident)


# ----------------------------------------------------------------------------
# Deterministic parameter init (shapes from the module's __init__)
# ----------------------------------------------------------------------------
def init_params(key, cin, cout):
    ch = cin // 2
    k = jax.random.split(key, 16)
    f32 = jnp.float32
    return {
        "wt": 0.2 * jax.random.normal(k[0], (cin, ch, 2, 2), f32),
        "bt": 0.1 * jax.random.normal(k[1], (ch,), f32),
        "w1": 0.2 * jax.random.normal(k[2], (cout, cin, 3, 3), f32),
        "b1": 0.1 * jax.random.normal(k[3], (cout,), f32),
        "g1": 1.0 + 0.1 * jax.random.normal(k[4], (cout,), f32),
        "be1": 0.1 * jax.random.normal(k[5], (cout,), f32),
        "m1": 0.1 * jax.random.normal(k[6], (cout,), f32),
        "v1": jax.random.uniform(k[7], (cout,), f32, 0.5, 1.5),
        "w2": 0.2 * jax.random.normal(k[8], (cout, cout, 3, 3), f32),
        "b2": 0.1 * jax.random.normal(k[9], (cout,), f32),
        "g2": 1.0 + 0.1 * jax.random.normal(k[10], (cout,), f32),
        "be2": 0.1 * jax.random.normal(k[11], (cout,), f32),
        "m2": 0.1 * jax.random.normal(k[12], (cout,), f32),
        "v2": jax.random.uniform(k[13], (cout,), f32, 0.5, 1.5),
        "wid": 0.2 * jax.random.normal(k[14], (cout, cin, 1, 1), f32),
        "bid": 0.1 * jax.random.normal(k[15], (cout,), f32),
    }


if __name__ == "__main__":
    N, Cin, Cout = 2, 4, 8
    H = W = 16                         # x: (2, 4, 16, 16);  skip: (2, 2, 32, 32)
    key = jax.random.PRNGKey(0)
    kx, ks, kp = jax.random.split(key, 3)
    x = jax.random.normal(kx, (N, Cin, H, W), jnp.float32)
    x_skip = jax.random.normal(ks, (N, Cin // 2, 2 * H, 2 * W), jnp.float32)
    params = init_params(kp, Cin, Cout)

    out = jax.block_until_ready(jax.jit(up_res_convolution)(x, x_skip, params))
    ref = jax.block_until_ready(reference(x, x_skip, params))

    assert out.shape == (N, Cout, 2 * H, 2 * W), out.shape
    # bf16 activations / weights with f32 accumulation -> relaxed tolerance
    max_err = float(jnp.max(jnp.abs(out - ref)))
    rms_err = float(jnp.sqrt(jnp.mean((out - ref) ** 2)))
    assert max_err < 1e-1 and rms_err < 2e-2, (max_err, rms_err)
    print("KERNEL_OK")
</pallas_src>

<mosaic_0001>
module attributes {stable_mosaic.version = 11 : i64} {
  func.func @_deconv_concat_kernel(%arg0: i32, %arg1: i32, %arg2: memref<1x1x16x128xbf16, #tpu.memory_space<vmem>>, %arg3: memref<1x2x32x128xbf16, #tpu.memory_space<vmem>>, %arg4: memref<2x2x128x128xbf16, #tpu.memory_space<vmem>>, %arg5: memref<1x128xf32, #tpu.memory_space<vmem>>, %arg6: memref<2x32x16xbf16, #tpu.memory_space<vmem>>, %arg7: memref<1x2x32x128xbf16, #tpu.memory_space<vmem>>) attributes {dimension_semantics = [#tpu.dimension_semantics<parallel>, #tpu.dimension_semantics<parallel>], iteration_bounds = array<i64: 2, 16>, scalar_prefetch = 0 : i64, scratch_operands = 0 : i64, tpu.core_type = #tpu.core_type<tc>, window_params = [{transform_indices = @transform_0, window_bounds = array<i64: 1, 1, 16, 128>}, {transform_indices = @transform_1, window_bounds = array<i64: 1, 2, 32, 128>}, {pipeline_mode = #tpu.pipeline_mode<synchronous>, transform_indices = @transform_2, window_bounds = array<i64: 2, 2, 128, 128>}, {pipeline_mode = #tpu.pipeline_mode<synchronous>, transform_indices = @transform_3, window_bounds = array<i64: 1, 128>}, {pipeline_mode = #tpu.pipeline_mode<synchronous>, transform_indices = @transform_4, window_bounds = array<i64: 2, 32, 16>}, {transform_indices = @transform_5, window_bounds = array<i64: 1, 2, 32, 128>}]} {
    %c0 = arith.constant 0 : index
    %c0_0 = arith.constant 0 : index
    %c0_1 = arith.constant 0 : index
    %c0_2 = arith.constant 0 : index
    %0 = vector.load %arg2[%c0, %c0_0, %c0_1, %c0_2] : memref<1x1x16x128xbf16, #tpu.memory_space<vmem>>, vector<1x1x16x128xbf16>
    %1 = vector.shape_cast %0 : vector<1x1x16x128xbf16> to vector<16x128xbf16>
    %c0_3 = arith.constant 0 : index
    %c0_4 = arith.constant 0 : index
    %2 = vector.load %arg5[%c0_3, %c0_4] : memref<1x128xf32, #tpu.memory_space<vmem>>, vector<1x128xf32>
    %3 = vector.shape_cast %2 : vector<1x128xf32> to vector<128xf32>
    %c0_5 = arith.constant 0 : index
    %c0_6 = arith.constant 0 : index
    %c0_7 = arith.constant 0 : index
    %c0_8 = arith.constant 0 : index
    %4 = vector.load %arg4[%c0_5, %c0_6, %c0_7, %c0_8] : memref<2x2x128x128xbf16, #tpu.memory_space<vmem>>, vector<1x1x128x128xbf16>
    %5 = vector.shape_cast %4 : vector<1x1x128x128xbf16> to vector<128x128xbf16>
    %cst = arith.constant dense<0.000000e+00> : vector<16x128xf32>
    %6 = tpu.matmul %1, %5, %cst {dimension_numbers = #tpu.dot_dimension_numbers<[1], [0], [0], [1], [0, 0, 1, 1], [], []>} : vector<16x128xbf16>, vector<128x128xbf16>, vector<16x128xf32> -> vector<16x128xf32>
    %c0_9 = arith.constant 0 : index
    %c0_10 = arith.constant 0 : index
    %c0_11 = arith.constant 0 : index
    %7 = vector.load %arg6[%c0_9, %c0_10, %c0_11] : memref<2x32x16xbf16, #tpu.memory_space<vmem>>, vector<1x32x16xbf16>
    %8 = vector.shape_cast %7 : vector<1x32x16xbf16> to vector<32x16xbf16>
    %9 = arith.truncf %6 : vector<16x128xf32> to vector<16x128xbf16>
    %cst_12 = arith.constant dense<0.000000e+00> : vector<32x128xf32>
    %10 = tpu.matmul %8, %9, %cst_12 {dimension_numbers = #tpu.dot_dimension_numbers<[1], [0], [0], [1], [0, 0, 1, 1], [], []>} : vector<32x16xbf16>, vector<16x128xbf16>, vector<32x128xf32> -> vector<32x128xf32>
    %c0_13 = arith.constant 0 : index
    %c1 = arith.constant 1 : index
    %c0_14 = arith.constant 0 : index
    %c0_15 = arith.constant 0 : index
    %11 = vector.load %arg4[%c0_13, %c1, %c0_14, %c0_15] : memref<2x2x128x128xbf16, #tpu.memory_space<vmem>>, vector<1x1x128x128xbf16>
    %12 = vector.shape_cast %11 : vector<1x1x128x128xbf16> to vector<128x128xbf16>
    %cst_16 = arith.constant dense<0.000000e+00> : vector<16x128xf32>
    %13 = tpu.matmul %1, %12, %cst_16 {dimension_numbers = #tpu.dot_dimension_numbers<[1], [0], [0], [1], [0, 0, 1, 1], [], []>} : vector<16x128xbf16>, vector<128x128xbf16>, vector<16x128xf32> -> vector<16x128xf32>
    %c1_17 = arith.constant 1 : index
    %c0_18 = arith.constant 0 : index
    %c0_19 = arith.constant 0 : index
    %14 = vector.load %arg6[%c1_17, %c0_18, %c0_19] : memref<2x32x16xbf16, #tpu.memory_space<vmem>>, vector<1x32x16xbf16>
    %15 = vector.shape_cast %14 : vector<1x32x16xbf16> to vector<32x16xbf16>
    %16 = arith.truncf %13 : vector<16x128xf32> to vector<16x128xbf16>
    %cst_20 = arith.constant dense<0.000000e+00> : vector<32x128xf32>
    %17 = tpu.matmul %15, %16, %cst_20 {dimension_numbers = #tpu.dot_dimension_numbers<[1], [0], [0], [1], [0, 0, 1, 1], [], []>} : vector<32x16xbf16>, vector<16x128xbf16>, vector<32x128xf32> -> vector<32x128xf32>
    %18 = arith.addf %10, %17 : vector<32x128xf32>
    %19 = vector.shape_cast %3 : vector<128xf32> to vector<1x128xf32>
    %20 = vector.broadcast %19 : vector<1x128xf32> to vector<32x128xf32>
    %21 = arith.addf %18, %20 : vector<32x128xf32>
    %c0_21 = arith.constant 0 : index
    %c0_22 = arith.constant 0 : index
    %c0_23 = arith.constant 0 : index
    %c0_24 = arith.constant 0 : index
    %22 = vector.load %arg3[%c0_21, %c0_22, %c0_23, %c0_24] : memref<1x2x32x128xbf16, #tpu.memory_space<vmem>>, vector<1x1x32x128xbf16>
    %23 = vector.shape_cast %22 : vector<1x1x32x128xbf16> to vector<32x128xbf16>
    %24 = arith.extf %23 : vector<32x128xbf16> to vector<32x128xf32>
    %25 = arith.addf %21, %24 : vector<32x128xf32>
    %26 = arith.truncf %25 : vector<32x128xf32> to vector<32x128xbf16>
    %c0_25 = arith.constant 0 : index
    %c0_26 = arith.constant 0 : index
    %c0_27 = arith.constant 0 : index
    %c0_28 = arith.constant 0 : index
    %27 = vector.load %arg7[%c0_25, %c0_26, %c0_27, %c0_28] : memref<1x2x32x128xbf16, #tpu.memory_space<vmem>>, vector<1x1x32x128xbf16>
    %28 = vector.shape_cast %27 : vector<1x1x32x128xbf16> to vector<32x128xbf16>
    %29 = vector.shape_cast %26 : vector<32x128xbf16> to vector<1x1x32x128xbf16>
    tpu.vector_store %arg7[%c0_25, %c0_26, %c0_27, %c0_28], %29 {strides = array<i32>} : memref<1x2x32x128xbf16, #tpu.memory_space<vmem>>, vector<1x1x32x128xbf16>,
    %c1_29 = arith.constant 1 : index
    %c0_30 = arith.constant 0 : index
    %c0_31 = arith.constant 0 : index
    %c0_32 = arith.constant 0 : index
    %30 = vector.load %arg4[%c1_29, %c0_30, %c0_31, %c0_32] : memref<2x2x128x128xbf16, #tpu.memory_space<vmem>>, vector<1x1x128x128xbf16>
    %31 = vector.shape_cast %30 : vector<1x1x128x128xbf16> to vector<128x128xbf16>
    %cst_33 = arith.constant dense<0.000000e+00> : vector<16x128xf32>
    %32 = tpu.matmul %1, %31, %cst_33 {dimension_numbers = #tpu.dot_dimension_numbers<[1], [0], [0], [1], [0, 0, 1, 1], [], []>} : vector<16x128xbf16>, vector<128x128xbf16>, vector<16x128xf32> -> vector<16x128xf32>
    %c0_34 = arith.constant 0 : index
    %c0_35 = arith.constant 0 : index
    %c0_36 = arith.constant 0 : index
    %33 = vector.load %arg6[%c0_34, %c0_35, %c0_36] : memref<2x32x16xbf16, #tpu.memory_space<vmem>>, vector<1x32x16xbf16>
    %34 = vector.shape_cast %33 : vector<1x32x16xbf16> to vector<32x16xbf16>
    %35 = arith.truncf %32 : vector<16x128xf32> to vector<16x128xbf16>
    %cst_37 = arith.constant dense<0.000000e+00> : vector<32x128xf32>
    %36 = tpu.matmul %34, %35, %cst_37 {dimension_numbers = #tpu.dot_dimension_numbers<[1], [0], [0], [1], [0, 0, 1, 1], [], []>} : vector<32x16xbf16>, vector<16x128xbf16>, vector<32x128xf32> -> vector<32x128xf32>
    %c1_38 = arith.constant 1 : index
    %c1_39 = arith.constant 1 : index
    %c0_40 = arith.constant 0 : index
    %c0_41 = arith.constant 0 : index
    %37 = vector.load %arg4[%c1_38, %c1_39, %c0_40, %c0_41] : memref<2x2x128x128xbf16, #tpu.memory_space<vmem>>, vector<1x1x128x128xbf16>
    %38 = vector.shape_cast %37 : vector<1x1x128x128xbf16> to vector<128x128xbf16>
    %cst_42 = arith.constant dense<0.000000e+00> : vector<16x128xf32>
    %39 = tpu.matmul %1, %38, %cst_42 {dimension_numbers = #tpu.dot_dimension_numbers<[1], [0], [0], [1], [0, 0, 1, 1], [], []>} : vector<16x128xbf16>, vector<128x128xbf16>, vector<16x128xf32> -> vector<16x128xf32>
    %c1_43 = arith.constant 1 : index
    %c0_44 = arith.constant 0 : index
    %c0_45 = arith.constant 0 : index
    %40 = vector.load %arg6[%c1_43, %c0_44, %c0_45] : memref<2x32x16xbf16, #tpu.memory_space<vmem>>, vector<1x32x16xbf16>
    %41 = vector.shape_cast %40 : vector<1x32x16xbf16> to vector<32x16xbf16>
    %42 = arith.truncf %39 : vector<16x128xf32> to vector<16x128xbf16>
    %cst_46 = arith.constant dense<0.000000e+00> : vector<32x128xf32>
    %43 = tpu.matmul %41, %42, %cst_46 {dimension_numbers = #tpu.dot_dimension_numbers<[1], [0], [0], [1], [0, 0, 1, 1], [], []>} : vector<32x16xbf16>, vector<16x128xbf16>, vector<32x128xf32> -> vector<32x128xf32>
    %44 = arith.addf %36, %43 : vector<32x128xf32>
    %45 = vector.shape_cast %3 : vector<128xf32> to vector<1x128xf32>
    %46 = vector.broadcast %45 : vector<1x128xf32> to vector<32x128xf32>
    %47 = arith.addf %44, %46 : vector<32x128xf32>
    %c0_47 = arith.constant 0 : index
    %c1_48 = arith.constant 1 : index
    %c0_49 = arith.constant 0 : index
    %c0_50 = arith.constant 0 : index
    %48 = vector.load %arg3[%c0_47, %c1_48, %c0_49, %c0_50] : memref<1x2x32x128xbf16, #tpu.memory_space<vmem>>, vector<1x1x32x128xbf16>
    %49 = vector.shape_cast %48 : vector<1x1x32x128xbf16> to vector<32x128xbf16>
    %50 = arith.extf %49 : vector<32x128xbf16> to vector<32x128xf32>
    %51 = arith.addf %47, %50 : vector<32x128xf32>
    %52 = arith.truncf %51 : vector<32x128xf32> to vector<32x128xbf16>
    %c0_51 = arith.constant 0 : index
    %c1_52 = arith.constant 1 : index
    %c0_53 = arith.constant 0 : index
    %c0_54 = arith.constant 0 : index
    %53 = vector.load %arg7[%c0_51, %c1_52, %c0_53, %c0_54] : memref<1x2x32x128xbf16, #tpu.memory_space<vmem>>, vector<1x1x32x128xbf16>
    %54 = vector.shape_cast %53 : vector<1x1x32x128xbf16> to vector<32x128xbf16>
    %55 = vector.shape_cast %52 : vector<32x128xbf16> to vector<1x1x32x128xbf16>
    tpu.vector_store %arg7[%c0_51, %c1_52, %c0_53, %c0_54], %55 {strides = array<i32>} : memref<1x2x32x128xbf16, #tpu.memory_space<vmem>>, vector<1x1x32x128xbf16>,
    return
  }
  func.func @transform_0(%arg0: i32, %arg1: i32) -> (i32, i32, i32, i32) {
    %c0_i32 = arith.constant 0 : i32
    %c0_i32_0 = arith.constant 0 : i32
    %c0_i32_1 = arith.constant 0 : i32
    return %arg0, %arg1, %c0_i32, %c0_i32_0 : i32, i32, i32, i32
  }
  func.func @transform_1(%arg0: i32, %arg1: i32) -> (i32, i32, i32, i32) {
    %c0_i32 = arith.constant 0 : i32
    %c0_i32_0 = arith.constant 0 : i32
    %c0_i32_1 = arith.constant 0 : i32
    return %arg0, %arg1, %c0_i32, %c0_i32_0 : i32, i32, i32, i32
  }
  func.func @transform_2(%arg0: i32, %arg1: i32) -> (i32, i32, i32, i32) {
    %c0_i32 = arith.constant 0 : i32
    %c0_i32_0 = arith.constant 0 : i32
    %c0_i32_1 = arith.constant 0 : i32
    %c0_i32_2 = arith.constant 0 : i32
    %c0_i32_3 = arith.constant 0 : i32
    return %c0_i32, %c0_i32_0, %c0_i32_1, %c0_i32_2 : i32, i32, i32, i32
  }
  func.func @transform_3(%arg0: i32, %arg1: i32) -> (i32, i32) {
    %c0_i32 = arith.constant 0 : i32
    %c0_i32_0 = arith.constant 0 : i32
    %c0_i32_1 = arith.constant 0 : i32
    return %c0_i32, %c0_i32_0 : i32, i32
  }
  func.func @transform_4(%arg0: i32, %arg1: i32) -> (i32, i32, i32) {
    %c0_i32 = arith.constant 0 : i32
    %c0_i32_0 = arith.constant 0 : i32
    %c0_i32_1 = arith.constant 0 : i32
    %c0_i32_2 = arith.constant 0 : i32
    return %c0_i32, %c0_i32_0, %c0_i32_1 : i32, i32, i32
  }
  func.func @transform_5(%arg0: i32, %arg1: i32) -> (i32, i32, i32, i32) {
    %c0_i32 = arith.constant 0 : i32
    %c0_i32_0 = arith.constant 0 : i32
    %c0_i32_1 = arith.constant 0 : i32
    return %arg0, %arg1, %c0_i32, %c0_i32_0 : i32, i32, i32, i32
  }
}

module attributes {stable_mosaic.version = 11 : i64} {
  func.func @_conv1_bn_relu_ident_kernel(%arg0: i32, %arg1: i32, %arg2: i32, %arg3: memref<1x1x34x128xbf16, #tpu.memory_space<vmem>>, %arg4: memref<9x128x128xbf16, #tpu.memory_space<vmem>>, %arg5: memref<1x128xf32, #tpu.memory_space<vmem>>, %arg6: memref<128x128xbf16, #tpu.memory_space<vmem>>, %arg7: memref<1x128xf32, #tpu.memory_space<vmem>>, %arg8: memref<1x1x32x128xbf16, #tpu.memory_space<vmem>>, %arg9: memref<1x1x32x128xbf16, #tpu.memory_space<vmem>>, %arg10: memref<32x128xf32, #tpu.memory_space<vmem>>, %arg11: memref<32x128xf32, #tpu.memory_space<vmem>>) attributes {dimension_semantics = [#tpu.dimension_semantics<parallel>, #tpu.dimension_semantics<parallel>, #tpu.dimension_semantics<arbitrary>], iteration_bounds = array<i64: 2, 32, 3>, scalar_prefetch = 0 : i64, scratch_operands = 2 : i64, tpu.core_type = #tpu.core_type<tc>, window_params = [{transform_indices = @transform_0, window_bounds = array<i64: 1, 1, 34, 128>}, {pipeline_mode = #tpu.pipeline_mode<synchronous>, transform_indices = @transform_1, window_bounds = array<i64: 9, 128, 128>}, {pipeline_mode = #tpu.pipeline_mode<synchronous>, transform_indices = @transform_2, window_bounds = array<i64: 1, 128>}, {pipeline_mode = #tpu.pipeline_mode<synchronous>, transform_indices = @transform_3, window_bounds = array<i64: 128, 128>}, {pipeline_mode = #tpu.pipeline_mode<synchronous>, transform_indices = @transform_4, window_bounds = array<i64: 1, 128>}, {transform_indices = @transform_5, window_bounds = array<i64: 1, 1, 32, 128>}, {transform_indices = @transform_6, window_bounds = array<i64: 1, 1, 32, 128>}]} {
    %c0_i32 = arith.constant 0 : i32
    %0 = arith.cmpi eq, %arg2, %c0_i32 : i32
    %1 = arith.extui %0 : i1 to i32
    %c0_i32_0 = arith.constant 0 : i32
    %2 = arith.cmpi ne, %1, %c0_i32_0 : i32
    scf.if %2 {
      %cst_23 = arith.constant 0.000000e+00 : f32
      %37 = vector.broadcast %cst_23 : f32 to vector<32x128xf32>
      %c0_24 = arith.constant 0 : index
      %c0_25 = arith.constant 0 : index
      %38 = vector.load %arg10[%c0_24, %c0_25] : memref<32x128xf32, #tpu.memory_space<vmem>>, vector<32x128xf32>
      tpu.vector_store %arg10[%c0_24, %c0_25], %37 {strides = array<i32>} : memref<32x128xf32, #tpu.memory_space<vmem>>, vector<32x128xf32>,
    } else {
    }
    %c0 = arith.constant 0 : index
    %c0_1 = arith.constant 0 : index
    %c0_2 = arith.constant 0 : index
    %c0_3 = arith.constant 0 : index
    %3 = vector.load %arg3[%c0, %c0_1, %c0_2, %c0_3] : memref<1x1x34x128xbf16, #tpu.memory_space<vmem>>, vector<1x1x34x128xbf16>
    %4 = vector.shape_cast %3 : vector<1x1x34x128xbf16> to vector<34x128xbf16>
    %c0_4 = arith.constant 0 : index
    %c0_5 = arith.constant 0 : index
    %5 = vector.load %arg10[%c0_4, %c0_5] : memref<32x128xf32, #tpu.memory_space<vmem>>, vector<32x128xf32>
    %6 = vector.extract_strided_slice %4 {offsets = [0, 0], sizes = [32, 128], strides = [1, 1]} : vector<34x128xbf16> to vector<32x128xbf16>
    %c3_i32 = arith.constant 3 : i32
    %7 = arith.muli %arg2, %c3_i32 : i32
    %c0_i32_6 = arith.constant 0 : i32
    %8 = arith.addi %7, %c0_i32_6 : i32
    %9 = arith.index_cast %8 : i32 to index
    %c0_7 = arith.constant 0 : index
    %c0_8 = arith.constant 0 : index
    %10 = vector.load %arg4[%9, %c0_7, %c0_8] : memref<9x128x128xbf16, #tpu.memory_space<vmem>>, vector<1x128x128xbf16>
    %11 = vector.shape_cast %10 : vector<1x128x128xbf16> to vector<128x128xbf16>
    %cst = arith.constant dense<0.000000e+00> : vector<32x128xf32>
    %12 = tpu.matmul %6, %11, %cst {dimension_numbers = #tpu.dot_dimension_numbers<[1], [0], [0], [1], [0, 0, 1, 1], [], []>} : vector<32x128xbf16>, vector<128x128xbf16>, vector<32x128xf32> -> vector<32x128xf32>
    %13 = arith.addf %5, %12 : vector<32x128xf32>
    %14 = vector.extract_strided_slice %4 {offsets = [1, 0], sizes = [32, 128], strides = [1, 1]} : vector<34x128xbf16> to vector<32x128xbf16>
    %c3_i32_9 = arith.constant 3 : i32
    %15 = arith.muli %arg2, %c3_i32_9 : i32
    %c1_i32 = arith.constant 1 : i32
    %16 = arith.addi %15, %c1_i32 : i32
    %17 = arith.index_cast %16 : i32 to index
    %c0_10 = arith.constant 0 : index
    %c0_11 = arith.constant 0 : index
    %18 = vector.load %arg4[%17, %c0_10, %c0_11] : memref<9x128x128xbf16, #tpu.memory_space<vmem>>, vector<1x128x128xbf16>
    %19 = vector.shape_cast %18 : vector<1x128x128xbf16> to vector<128x128xbf16>
    %cst_12 = arith.constant dense<0.000000e+00> : vector<32x128xf32>
    %20 = tpu.matmul %14, %19, %cst_12 {dimension_numbers = #tpu.dot_dimension_numbers<[1], [0], [0], [1], [0, 0, 1, 1], [], []>} : vector<32x128xbf16>, vector<128x128xbf16>, vector<32x128xf32> -> vector<32x128xf32>
    %21 = arith.addf %13, %20 : vector<32x128xf32>
    %22 = vector.extract_strided_slice %4 {offsets = [2, 0], sizes = [32, 128], strides = [1, 1]} : vector<34x128xbf16> to vector<32x128xbf16>
    %c3_i32_13 = arith.constant 3 : i32
    %23 = arith.muli %arg2, %c3_i32_13 : i32
    %c2_i32 = arith.constant 2 : i32
    %24 = arith.addi %23, %c2_i32 : i32
    %25 = arith.index_cast %24 : i32 to index
    %c0_14 = arith.constant 0 : index
    %c0_15 = arith.constant 0 : index
    %26 = vector.load %arg4[%25, %c0_14, %c0_15] : memref<9x128x128xbf16, #tpu.memory_space<vmem>>, vector<1x128x128xbf16>
    %27 = vector.shape_cast %26 : vector<1x128x128xbf16> to vector<128x128xbf16>
    %cst_16 = arith.constant dense<0.000000e+00> : vector<32x128xf32>
    %28 = tpu.matmul %22, %27, %cst_16 {dimension_numbers = #tpu.dot_dimension_numbers<[1], [0], [0], [1], [0, 0, 1, 1], [], []>} : vector<32x128xbf16>, vector<128x128xbf16>, vector<32x128xf32> -> vector<32x128xf32>
    %29 = arith.addf %21, %28 : vector<32x128xf32>
    %c0_17 = arith.constant 0 : index
    %c0_18 = arith.constant 0 : index
    %30 = vector.load %arg10[%c0_17, %c0_18] : memref<32x128xf32, #tpu.memory_space<vmem>>, vector<32x128xf32>
    tpu.vector_store %arg10[%c0_17, %c0_18], %29 {strides = array<i32>} : memref<32x128xf32, #tpu.memory_space<vmem>>, vector<32x128xf32>,
    %c1_i32_19 = arith.constant 1 : i32
    %31 = arith.cmpi eq, %arg2, %c1_i32_19 : i32
    %32 = arith.extui %31 : i1 to i32
    %c0_i32_20 = arith.constant 0 : i32
    %33 = arith.cmpi ne, %32, %c0_i32_20 : i32
    scf.if %33 {
      %37 = vector.extract_strided_slice %4 {offsets = [1, 0], sizes = [32, 128], strides = [1, 1]} : vector<34x128xbf16> to vector<32x128xbf16>
      %c0_23 = arith.constant 0 : index
      %c0_24 = arith.constant 0 : index
      %38 = vector.load %arg6[%c0_23, %c0_24] : memref<128x128xbf16, #tpu.memory_space<vmem>>, vector<128x128xbf16>
      %cst_25 = arith.constant dense<0.000000e+00> : vector<32x128xf32>
      %39 = tpu.matmul %37, %38, %cst_25 {dimension_numbers = #tpu.dot_dimension_numbers<[1], [0], [0], [1], [0, 0, 1, 1], [], []>} : vector<32x128xbf16>, vector<128x128xbf16>, vector<32x128xf32> -> vector<32x128xf32>
      %c0_26 = arith.constant 0 : index
      %c0_27 = arith.constant 0 : index
      %40 = vector.load %arg7[%c0_26, %c0_27] : memref<1x128xf32, #tpu.memory_space<vmem>>, vector<1x128xf32>
      %41 = vector.shape_cast %40 : vector<1x128xf32> to vector<128xf32>
      %42 = vector.shape_cast %41 : vector<128xf32> to vector<1x128xf32>
      %43 = vector.broadcast %42 : vector<1x128xf32> to vector<32x128xf32>
      %44 = arith.addf %39, %43 : vector<32x128xf32>
      %c0_28 = arith.constant 0 : index
      %c0_29 = arith.constant 0 : index
      %45 = vector.load %arg11[%c0_28, %c0_29] : memref<32x128xf32, #tpu.memory_space<vmem>>, vector<32x128xf32>
      tpu.vector_store %arg11[%c0_28, %c0_29], %44 {strides = array<i32>} : memref<32x128xf32, #tpu.memory_space<vmem>>, vector<32x128xf32>,
    } else {
    }
    %c2_i32_21 = arith.constant 2 : i32
    %34 = arith.cmpi eq, %arg2, %c2_i32_21 : i32
    %35 = arith.extui %34 : i1 to i32
    %c0_i32_22 = arith.constant 0 : i32
    %36 = arith.cmpi ne, %35, %c0_i32_22 : i32
    scf.if %36 {
      %c0_23 = arith.constant 0 : index
      %c0_24 = arith.constant 0 : index
      %37 = vector.load %arg10[%c0_23, %c0_24] : memref<32x128xf32, #tpu.memory_space<vmem>>, vector<32x128xf32>
      %c0_25 = arith.constant 0 : index
      %c0_26 = arith.constant 0 : index
      %38 = vector.load %arg5[%c0_25, %c0_26] : memref<1x128xf32, #tpu.memory_space<vmem>>, vector<1x128xf32>
      %39 = vector.shape_cast %38 : vector<1x128xf32> to vector<128xf32>
      %40 = vector.shape_cast %39 : vector<128xf32> to vector<1x128xf32>
      %41 = vector.broadcast %40 : vector<1x128xf32> to vector<32x128xf32>
      %42 = arith.addf %37, %41 : vector<32x128xf32>
      %cst_27 = arith.constant 0.000000e+00 : f32
      %43 = vector.broadcast %cst_27 : f32 to vector<32x128xf32>
      %44 = arith.maximumf %42, %43 : vector<32x128xf32>
      %45 = arith.truncf %44 : vector<32x128xf32> to vector<32x128xbf16>
      %c0_28 = arith.constant 0 : index
      %c0_29 = arith.constant 0 : index
      %c0_30 = arith.constant 0 : index
      %c0_31 = arith.constant 0 : index
      %46 = vector.load %arg8[%c0_28, %c0_29, %c0_30, %c0_31] : memref<1x1x32x128xbf16, #tpu.memory_space<vmem>>, vector<1x1x32x128xbf16>
      %47 = vector.shape_cast %46 : vector<1x1x32x128xbf16> to vector<32x128xbf16>
      %48 = vector.shape_cast %45 : vector<32x128xbf16> to vector<1x1x32x128xbf16>
      tpu.vector_store %arg8[%c0_28, %c0_29, %c0_30, %c0_31], %48 {strides = array<i32>} : memref<1x1x32x128xbf16, #tpu.memory_space<vmem>>, vector<1x1x32x128xbf16>,
      %c0_32 = arith.constant 0 : index
      %c0_33 = arith.constant 0 : index
      %49 = vector.load %arg11[%c0_32, %c0_33] : memref<32x128xf32, #tpu.memory_space<vmem>>, vector<32x128xf32>
      %50 = arith.truncf %49 : vector<32x128xf32> to vector<32x128xbf16>
      %c0_34 = arith.constant 0 : index
      %c0_35 = arith.constant 0 : index
      %c0_36 = arith.constant 0 : index
      %c0_37 = arith.constant 0 : index
      %51 = vector.load %arg9[%c0_34, %c0_35, %c0_36, %c0_37] : memref<1x1x32x128xbf16, #tpu.memory_space<vmem>>, vector<1x1x32x128xbf16>
      %52 = vector.shape_cast %51 : vector<1x1x32x128xbf16> to vector<32x128xbf16>
      %53 = vector.shape_cast %50 : vector<32x128xbf16> to vector<1x1x32x128xbf16>
      tpu.vector_store %arg9[%c0_34, %c0_35, %c0_36, %c0_37], %53 {strides = array<i32>} : memref<1x1x32x128xbf16, #tpu.memory_space<vmem>>, vector<1x1x32x128xbf16>,
    } else {
    }
    return
  }
  func.func @transform_0(%arg0: i32, %arg1: i32, %arg2: i32) -> (i32, i32, i32, i32) {
    %0 = arith.addi %arg1, %arg2 : i32
    %c0_i32 = arith.constant 0 : i32
    %c0_i32_0 = arith.constant 0 : i32
    %c0_i32_1 = arith.constant 0 : i32
    return %arg0, %0, %c0_i32, %c0_i32_0 : i32, i32, i32, i32
  }
  func.func @transform_1(%arg0: i32, %arg1: i32, %arg2: i32) -> (i32, i32, i32) {
    %c0_i32 = arith.constant 0 : i32
    %c0_i32_0 = arith.constant 0 : i32
    %c0_i32_1 = arith.constant 0 : i32
    %c0_i32_2 = arith.constant 0 : i32
    return %c0_i32, %c0_i32_0, %c0_i32_1 : i32, i32, i32
  }
  func.func @transform_2(%arg0: i32, %arg1: i32, %arg2: i32) -> (i32, i32) {
    %c0_i32 = arith.constant 0 : i32
    %c0_i32_0 = arith.constant 0 : i32
    %c0_i32_1 = arith.constant 0 : i32
    return %c0_i32, %c0_i32_0 : i32, i32
  }
  func.func @transform_3(%arg0: i32, %arg1: i32, %arg2: i32) -> (i32, i32) {
    %c0_i32 = arith.constant 0 : i32
    %c0_i32_0 = arith.constant 0 : i32
    %c0_i32_1 = arith.constant 0 : i32
    return %c0_i32, %c0_i32_0 : i32, i32
  }
  func.func @transform_4(%arg0: i32, %arg1: i32, %arg2: i32) -> (i32, i32) {
    %c0_i32 = arith.constant 0 : i32
    %c0_i32_0 = arith.constant 0 : i32
    %c0_i32_1 = arith.constant 0 : i32
    return %c0_i32, %c0_i32_0 : i32, i32
  }
  func.func @transform_5(%arg0: i32, %arg1: i32, %arg2: i32) -> (i32, i32, i32, i32) {
    %c0_i32 = arith.constant 0 : i32
    %c0_i32_0 = arith.constant 0 : i32
    %c0_i32_1 = arith.constant 0 : i32
    return %arg0, %arg1, %c0_i32, %c0_i32_0 : i32, i32, i32, i32
  }
  func.func @transform_6(%arg0: i32, %arg1: i32, %arg2: i32) -> (i32, i32, i32, i32) {
    %c0_i32 = arith.constant 0 : i32
    %c0_i32_0 = arith.constant 0 : i32
    %c0_i32_1 = arith.constant 0 : i32
    return %arg0, %arg1, %c0_i32, %c0_i32_0 : i32, i32, i32, i32
  }
}

module attributes {stable_mosaic.version = 11 : i64} {
  func.func @_conv2_bn_add_relu_kernel(%arg0: i32, %arg1: i32, %arg2: i32, %arg3: memref<1x1x34x128xbf16, #tpu.memory_space<vmem>>, %arg4: memref<1x1x32x128xbf16, #tpu.memory_space<vmem>>, %arg5: memref<9x128x128xbf16, #tpu.memory_space<vmem>>, %arg6: memref<1x128xf32, #tpu.memory_space<vmem>>, %arg7: memref<1x1x32x128xf32, #tpu.memory_space<vmem>>, %arg8: memref<32x128xf32, #tpu.memory_space<vmem>>) attributes {dimension_semantics = [#tpu.dimension_semantics<parallel>, #tpu.dimension_semantics<parallel>, #tpu.dimension_semantics<arbitrary>], iteration_bounds = array<i64: 2, 32, 3>, scalar_prefetch = 0 : i64, scratch_operands = 1 : i64, tpu.core_type = #tpu.core_type<tc>, window_params = [{transform_indices = @transform_0, window_bounds = array<i64: 1, 1, 34, 128>}, {transform_indices = @transform_1, window_bounds = array<i64: 1, 1, 32, 128>}, {pipeline_mode = #tpu.pipeline_mode<synchronous>, transform_indices = @transform_2, window_bounds = array<i64: 9, 128, 128>}, {pipeline_mode = #tpu.pipeline_mode<synchronous>, transform_indices = @transform_3, window_bounds = array<i64: 1, 128>}, {transform_indices = @transform_4, window_bounds = array<i64: 1, 1, 32, 128>}]} {
    %c0_i32 = arith.constant 0 : i32
    %0 = arith.cmpi eq, %arg2, %c0_i32 : i32
    %1 = arith.extui %0 : i1 to i32
    %c0_i32_0 = arith.constant 0 : i32
    %2 = arith.cmpi ne, %1, %c0_i32_0 : i32
    scf.if %2 {
      %cst_21 = arith.constant 0.000000e+00 : f32
      %34 = vector.broadcast %cst_21 : f32 to vector<32x128xf32>
      %c0_22 = arith.constant 0 : index
      %c0_23 = arith.constant 0 : index
      %35 = vector.load %arg8[%c0_22, %c0_23] : memref<32x128xf32, #tpu.memory_space<vmem>>, vector<32x128xf32>
      tpu.vector_store %arg8[%c0_22, %c0_23], %34 {strides = array<i32>} : memref<32x128xf32, #tpu.memory_space<vmem>>, vector<32x128xf32>,
    } else {
    }
    %c0 = arith.constant 0 : index
    %c0_1 = arith.constant 0 : index
    %c0_2 = arith.constant 0 : index
    %c0_3 = arith.constant 0 : index
    %3 = vector.load %arg3[%c0, %c0_1, %c0_2, %c0_3] : memref<1x1x34x128xbf16, #tpu.memory_space<vmem>>, vector<1x1x34x128xbf16>
    %4 = vector.shape_cast %3 : vector<1x1x34x128xbf16> to vector<34x128xbf16>
    %c0_4 = arith.constant 0 : index
    %c0_5 = arith.constant 0 : index
    %5 = vector.load %arg8[%c0_4, %c0_5] : memref<32x128xf32, #tpu.memory_space<vmem>>, vector<32x128xf32>
    %6 = vector.extract_strided_slice %4 {offsets = [0, 0], sizes = [32, 128], strides = [1, 1]} : vector<34x128xbf16> to vector<32x128xbf16>
    %c3_i32 = arith.constant 3 : i32
    %7 = arith.muli %arg2, %c3_i32 : i32
    %c0_i32_6 = arith.constant 0 : i32
    %8 = arith.addi %7, %c0_i32_6 : i32
    %9 = arith.index_cast %8 : i32 to index
    %c0_7 = arith.constant 0 : index
    %c0_8 = arith.constant 0 : index
    %10 = vector.load %arg5[%9, %c0_7, %c0_8] : memref<9x128x128xbf16, #tpu.memory_space<vmem>>, vector<1x128x128xbf16>
    %11 = vector.shape_cast %10 : vector<1x128x128xbf16> to vector<128x128xbf16>
    %cst = arith.constant dense<0.000000e+00> : vector<32x128xf32>
    %12 = tpu.matmul %6, %11, %cst {dimension_numbers = #tpu.dot_dimension_numbers<[1], [0], [0], [1], [0, 0, 1, 1], [], []>} : vector<32x128xbf16>, vector<128x128xbf16>, vector<32x128xf32> -> vector<32x128xf32>
    %13 = arith.addf %5, %12 : vector<32x128xf32>
    %14 = vector.extract_strided_slice %4 {offsets = [1, 0], sizes = [32, 128], strides = [1, 1]} : vector<34x128xbf16> to vector<32x128xbf16>
    %c3_i32_9 = arith.constant 3 : i32
    %15 = arith.muli %arg2, %c3_i32_9 : i32
    %c1_i32 = arith.constant 1 : i32
    %16 = arith.addi %15, %c1_i32 : i32
    %17 = arith.index_cast %16 : i32 to index
    %c0_10 = arith.constant 0 : index
    %c0_11 = arith.constant 0 : index
    %18 = vector.load %arg5[%17, %c0_10, %c0_11] : memref<9x128x128xbf16, #tpu.memory_space<vmem>>, vector<1x128x128xbf16>
    %19 = vector.shape_cast %18 : vector<1x128x128xbf16> to vector<128x128xbf16>
    %cst_12 = arith.constant dense<0.000000e+00> : vector<32x128xf32>
    %20 = tpu.matmul %14, %19, %cst_12 {dimension_numbers = #tpu.dot_dimension_numbers<[1], [0], [0], [1], [0, 0, 1, 1], [], []>} : vector<32x128xbf16>, vector<128x128xbf16>, vector<32x128xf32> -> vector<32x128xf32>
    %21 = arith.addf %13, %20 : vector<32x128xf32>
    %22 = vector.extract_strided_slice %4 {offsets = [2, 0], sizes = [32, 128], strides = [1, 1]} : vector<34x128xbf16> to vector<32x128xbf16>
    %c3_i32_13 = arith.constant 3 : i32
    %23 = arith.muli %arg2, %c3_i32_13 : i32
    %c2_i32 = arith.constant 2 : i32
    %24 = arith.addi %23, %c2_i32 : i32
    %25 = arith.index_cast %24 : i32 to index
    %c0_14 = arith.constant 0 : index
    %c0_15 = arith.constant 0 : index
    %26 = vector.load %arg5[%25, %c0_14, %c0_15] : memref<9x128x128xbf16, #tpu.memory_space<vmem>>, vector<1x128x128xbf16>
    %27 = vector.shape_cast %26 : vector<1x128x128xbf16> to vector<128x128xbf16>
    %cst_16 = arith.constant dense<0.000000e+00> : vector<32x128xf32>
    %28 = tpu.matmul %22, %27, %cst_16 {dimension_numbers = #tpu.dot_dimension_numbers<[1], [0], [0], [1], [0, 0, 1, 1], [], []>} : vector<32x128xbf16>, vector<128x128xbf16>, vector<32x128xf32> -> vector<32x128xf32>
    %29 = arith.addf %21, %28 : vector<32x128xf32>
    %c0_17 = arith.constant 0 : index
    %c0_18 = arith.constant 0 : index
    %30 = vector.load %arg8[%c0_17, %c0_18] : memref<32x128xf32, #tpu.memory_space<vmem>>, vector<32x128xf32>
    tpu.vector_store %arg8[%c0_17, %c0_18], %29 {strides = array<i32>} : memref<32x128xf32, #tpu.memory_space<vmem>>, vector<32x128xf32>,
    %c2_i32_19 = arith.constant 2 : i32
    %31 = arith.cmpi eq, %arg2, %c2_i32_19 : i32
    %32 = arith.extui %31 : i1 to i32
    %c0_i32_20 = arith.constant 0 : i32
    %33 = arith.cmpi ne, %32, %c0_i32_20 : i32
    scf.if %33 {
      %c0_21 = arith.constant 0 : index
      %c0_22 = arith.constant 0 : index
      %34 = vector.load %arg8[%c0_21, %c0_22] : memref<32x128xf32, #tpu.memory_space<vmem>>, vector<32x128xf32>
      %c0_23 = arith.constant 0 : index
      %c0_24 = arith.constant 0 : index
      %35 = vector.load %arg6[%c0_23, %c0_24] : memref<1x128xf32, #tpu.memory_space<vmem>>, vector<1x128xf32>
      %36 = vector.shape_cast %35 : vector<1x128xf32> to vector<128xf32>
      %37 = vector.shape_cast %36 : vector<128xf32> to vector<1x128xf32>
      %38 = vector.broadcast %37 : vector<1x128xf32> to vector<32x128xf32>
      %39 = arith.addf %34, %38 : vector<32x128xf32>
      %c0_25 = arith.constant 0 : index
      %c0_26 = arith.constant 0 : index
      %c0_27 = arith.constant 0 : index
      %c0_28 = arith.constant 0 : index
      %40 = vector.load %arg4[%c0_25, %c0_26, %c0_27, %c0_28] : memref<1x1x32x128xbf16, #tpu.memory_space<vmem>>, vector<1x1x32x128xbf16>
      %41 = vector.shape_cast %40 : vector<1x1x32x128xbf16> to vector<32x128xbf16>
      %42 = arith.extf %41 : vector<32x128xbf16> to vector<32x128xf32>
      %43 = arith.addf %39, %42 : vector<32x128xf32>
      %cst_29 = arith.constant 0.000000e+00 : f32
      %44 = vector.broadcast %cst_29 : f32 to vector<32x128xf32>
      %45 = arith.maximumf %43, %44 : vector<32x128xf32>
      %c0_30 = arith.constant 0 : index
      %c0_31 = arith.constant 0 : index
      %c0_32 = arith.constant 0 : index
      %c0_33 = arith.constant 0 : index
      %46 = vector.load %arg7[%c0_30, %c0_31, %c0_32, %c0_33] : memref<1x1x32x128xf32, #tpu.memory_space<vmem>>, vector<1x1x32x128xf32>
      %47 = vector.shape_cast %46 : vector<1x1x32x128xf32> to vector<32x128xf32>
      %48 = vector.shape_cast %45 : vector<32x128xf32> to vector<1x1x32x128xf32>
      tpu.vector_store %arg7[%c0_30, %c0_31, %c0_32, %c0_33], %48 {strides = array<i32>} : memref<1x1x32x128xf32, #tpu.memory_space<vmem>>, vector<1x1x32x128xf32>,
    } else {
    }
    return
  }
  func.func @transform_0(%arg0: i32, %arg1: i32, %arg2: i32) -> (i32, i32, i32, i32) {
    %0 = arith.addi %arg1, %arg2 : i32
    %c0_i32 = arith.constant 0 : i32
    %c0_i32_0 = arith.constant 0 : i32
    %c0_i32_1 = arith.constant 0 : i32
    return %arg0, %0, %c0_i32, %c0_i32_0 : i32, i32, i32, i32
  }
  func.func @transform_1(%arg0: i32, %arg1: i32, %arg2: i32) -> (i32, i32, i32, i32) {
    %c0_i32 = arith.constant 0 : i32
    %c0_i32_0 = arith.constant 0 : i32
    %c0_i32_1 = arith.constant 0 : i32
    return %arg0, %arg1, %c0_i32, %c0_i32_0 : i32, i32, i32, i32
  }
  func.func @transform_2(%arg0: i32, %arg1: i32, %arg2: i32) -> (i32, i32, i32) {
    %c0_i32 = arith.constant 0 : i32
    %c0_i32_0 = arith.constant 0 : i32
    %c0_i32_1 = arith.constant 0 : i32
    %c0_i32_2 = arith.constant 0 : i32
    return %c0_i32, %c0_i32_0, %c0_i32_1 : i32, i32, i32
  }
  func.func @transform_3(%arg0: i32, %arg1: i32, %arg2: i32) -> (i32, i32) {
    %c0_i32 = arith.constant 0 : i32
    %c0_i32_0 = arith.constant 0 : i32
    %c0_i32_1 = arith.constant 0 : i32
    return %c0_i32, %c0_i32_0 : i32, i32
  }
  func.func @transform_4(%arg0: i32, %arg1: i32, %arg2: i32) -> (i32, i32, i32, i32) {
    %c0_i32 = arith.constant 0 : i32
    %c0_i32_0 = arith.constant 0 : i32
    %c0_i32_1 = arith.constant 0 : i32
    return %arg0, %arg1, %c0_i32, %c0_i32_0 : i32, i32, i32, i32
  }
}

</mosaic_0001>

<bundles_post_ra>
// kernel: up_res_convolution.3
= control target key start
LH: loop header
LB: loop body
LE: loop exit
PB: predicated region body
PF: predicated region fallthrough
CT: control target
= control target key end

     0   :  { %s1715_s18 = smov 0   ;;  %s1717_s19 = smov 0   ;;  %s1984_s0 = inlined_call_operand.vmem [shape: bf16[2,16,16,128], index: 0, kind: input, shape index: {}]   ;;  %s1985_s1 = inlined_call_operand.vmem [shape: bf16[2,32,32,128], index: 1, kind: input, shape index: {}]   ;;  %s1986_s2 = inlined_call_operand.vmem [shape: bf16[2,2,128,128], index: 2, kind: input, shape index: {}]   ;;  %s1987_s3 = inlined_call_operand.vmem [shape: f32[1,128], index: 3, kind: input, shape index: {}]   ;;  %s1988_s4 = inlined_call_operand.vmem [shape: bf16[2,32,16], index: 4, kind: input, shape index: {}]   ;;  %s1989_s5 = inlined_call_operand.vmem [shape: bf16[2,32,32,128], index: 5, kind: output, shape index: {}]  }
   0x1   :  { %s1719_s20 = smov 0   ;;  %s1721_s21 = smov 0  }
   0x2   :  { %s1723_s22 = smov 0  }
   0x3 LB: > { %s24_s23 = sadd.s32 1, %s1673_s20  ;;  %s27_s24 = sadd.s32 1, %s1677_s21  ;;  %s1681_s22 = sphi %s1723_s22, %s15_s22   ;;  %s1677_s21 = sphi %s1721_s21, %s1993_s21   ;;  %s1673_s20 = sphi %s1719_s20, %s1992_s20   ;;  %s1669_s19 = sphi %s1717_s19, %s1991_s19   ;;  %s1665_s18 = sphi %s1715_s18, %s1990_s18  }
   0x4   : > { %p25_p0 = scmp.ge.s32.totalorder %s24_s23, 16  ;;  %p1222_p1 = scmp.ge.s32.totalorder %s1681_s22, 1 }
   0x5   : > { %p225_p2 = scmp.lt.s32.totalorder %s1681_s22, 33 }
   0x6   : > { %s1995_s23 = smov (%p25_p0, %s24_s23), 0  ;;  %s1997_s24 = smov (!%p25_p0, %s27_s24), %s1677_s21 }
   0x7   : > { %p226_p3 = pnand %p1222_p1, %p225_p2  ;;  %p29_p4 = scmp.ge.s32.totalorder %s1997_s24, 2 }
   0x8   : > { %p272_p5 = scmp.lt.s32.totalorder (!%p226_p3), %s1669_s19, 1  ;;  %p274_p6 = scmp.lt.s32.totalorder (!%p226_p3), %s1665_s18, 15 }
   0x9   : > { %s1999_s24 = smov (%p29_p4, %s1997_s24), 0  ;;  %229 = sbr.rel (%p226_p3) target bundleno = 694 (0x2b6), region = 40 }
   0xa   : > { %s1226_s12 = sshll.u32 (!%p226_p3), %s1665_s18, 1 }
   0xb   : > { %p284_p7 = scmp.lt.s32.totalorder (!%p226_p3), %s1226_s12, 31 }
   0xe   : > { %v1602_v0 = vld [vmem:[%s1986_s2 + $0x38] sm:$0xff]   ;;  %v1683_v1 = vmov 0.0   ;;  %v1604_v3 = vld [vmem:[%s1986_s2 + $0x30] sm:$0xff]   ;;  %vm1684_vm0 = vmmov 0   ;;  %s2001_s19 = smov (!%p272_p5, %s1669_s19), 1  ;;  %v1606_v5 = vld [vmem:[%s1986_s2 + $0x28] sm:$0xff]  }
   0xf   : > { %1456 = vmatprep.subr.bf16.mxu0 %v1683_v1  ;;  %1476 = vmatprep.subr.bf16.mxu1 %v1683_v1  ;;  %v1603_v2 = vld [vmem:[%s1986_s2 + $0x78] sm:$0xff]   ;;  %v1605_v4 = vld [vmem:[%s1986_s2 + $0x70] sm:$0xff]   ;;  %s275_s8 = scalar_select %p274_p6, %s1665_s18, 15  ;;  %v1607_v6 = vld [vmem:[%s1986_s2 + $0x68] sm:$0xff]   ;;  %vm545_vm1 = vcmask 130048  }
  0x10   : > { %1457 = vmatpush3.bf16.msra.mxu0 %v1602_v0  ;;  %1472 = vmatprep.mubr.msk.bf16.mxu0 %vm1684_vm0, %v1683_v1  ;;  %s1224_s11 = sshll.u32 %s2001_s19, 5  ;;  %v1608_v7 = vld [vmem:[%s1986_s2 + $0x20] sm:$0xff]   ;;  %v1610_v9 = vld [vmem:[%s1986_s2 + $0x18] sm:$0xff]   ;;  %v1612_v11 = vld [vmem:[%s1986_s2 + $0x10] sm:$0xff]   ;;  %s2003_s12 = smov (!%p284_p7, %s1226_s12), 31 }
  0x11   : > { %1477 = vmatpush3.bf16.msra.mxu1 %v1603_v2  ;;  %1458 = vmatprep.subr.bf16.mxu0 %v1683_v1  ;;  %s1223_s14 = sshll.u32 %s275_s8, 1  ;;  %v1609_v8 = vld [vmem:[%s1986_s2 + $0x60] sm:$0xff]   ;;  %v1611_v10 = vld [vmem:[%s1986_s2 + $0x58] sm:$0xff]   ;;  %v1613_v12 = vld [vmem:[%s1986_s2 + $0x50] sm:$0xff]   ;;  %s1227_s13 = sshll.u32 %s2003_s12, 2 }
  0x12   : > { %1478 = vmatprep.subr.bf16.mxu1 %v1683_v1  ;;  %1492 = vmatprep.mubr.msk.bf16.mxu1 %vm1684_vm0, %v1683_v1  ;;  %s278_s15 = sadd.s32 %s1224_s11, %s1223_s14  ;;  %v1614_v13 = vld [vmem:[%s1986_s2 + $0x8] sm:$0xff]   ;;  %v1616_v15 = vld [vmem:[%s1986_s2] sm:$0xff]   ;;  %v1619_v18 = vld [vmem:[%s1988_s4 + $0x10] sm:$0xff]   ;;  %s1228_s14 = sshll.u32 %s2001_s19, 7 }
  0x13   : > { %s1225_s27 = sshll.u32 %s278_s15, 2  ;;  %v1615_v14 = vld [vmem:[%s1986_s2 + $0x48] sm:$0xff]   ;;  %v1617_v16 = vld [vmem:[%s1986_s2 + $0x40] sm:$0xff]   ;;  %v1621_v31 = vld [vmem:[%s1988_s4 + $0x18] sm:$0xff]   ;;  %s1927_s15 = sadd.s32 %s1228_s14, %s1227_s13 }
  0x14   : > { %1459 = vmatpush3.bf16.msra.mxu0 %v1604_v3  ;;  %s280_s9 = scalar_lea.vmem %s1984_s0, %s1225_s27  ;;  %v1620_v19 = vld [vmem:[%s1988_s4] sm:$0xff]   ;;  %v1622_v30 = vld [vmem:[%s1988_s4 + $0x8] sm:$0xff]   ;;  %v1624_v32 = vld [vmem:[%s1986_s2 + $0xf8] sm:$0xff]   ;;  %s1229_s16 = sshll.u32 %s1927_s15, 2 }
  0x15   : > { %1479 = vmatpush3.bf16.msra.mxu1 %v1605_v4  ;;  %1460 = vmatprep.subr.bf16.mxu0 %v1683_v1  ;;  %v1826_v17 = vld [vmem:[%s280_s9] sm:$0xff]   ;;  %v1623_v33 = vld [vmem:[%s1986_s2 + $0xb8] sm:$0xff]   ;;  %v1626_v34 = vld [vmem:[%s1986_s2 + $0xf0] sm:$0xff]   ;;  %s1933_s26 = scalar_lea.vmem %s1985_s1, %s1229_s16  ;;  %s1949_s29 = scalar_lea.vmem %s1989_s5, %s1229_s16 }
  0x16   : > { %1480 = vmatprep.subr.bf16.mxu1 %v1683_v1  ;;  %v1625_v35 = vld [vmem:[%s1986_s2 + $0xb0] sm:$0xff]   ;;  %v1628_v36 = vld [vmem:[%s1986_s2 + $0xe8] sm:$0xff]   ;;  %v1630_v38 = vld [vmem:[%s1986_s2 + $0xe0] sm:$0xff]  }
  0x17   : > { %v1627_v37 = vld [vmem:[%s1986_s2 + $0xa8] sm:$0xff]   ;;  %v1629_v39 = vld [vmem:[%s1986_s2 + $0xa0] sm:$0xff]   ;;  %v1632_v40 = vld [vmem:[%s1986_s2 + $0xd8] sm:$0xff]  }
  0x18   : > { %1461 = vmatpush3.bf16.msra.mxu0 %v1606_v5  ;;  %v1631_v41 = vld [vmem:[%s1986_s2 + $0x98] sm:$0xff]   ;;  %v1634_v42 = vld [vmem:[%s1986_s2 + $0xd0] sm:$0xff]   ;;  %v1636_v44 = vld [vmem:[%s1986_s2 + $0xc8] sm:$0xff]  }
  0x19   : > { %1481 = vmatpush3.bf16.msra.mxu1 %v1607_v6  ;;  %1462 = vmatprep.subr.bf16.mxu0 %v1683_v1  ;;  %v1633_v43 = vld [vmem:[%s1986_s2 + $0x90] sm:$0xff]   ;;  %v1635_v45 = vld [vmem:[%s1986_s2 + $0x88] sm:$0xff]   ;;  %v1638_v46 = vld [vmem:[%s1986_s2 + $0xc0] sm:$0xff]  }
  0x1a   : > { %1482 = vmatprep.subr.bf16.mxu1 %v1683_v1  ;;  %v1637_v47 = vld [vmem:[%s1986_s2 + $0x80] sm:$0xff]   ;;  %v1639_v48 = vld [vmem:[%s1988_s4 + $0x10] sm:$0xff]   ;;  %v1402_v55 = vld [vmem:[%s1933_s26 + $0x8] sm:$0xff]  }
  0x1b   : > { %v1640_v49 = vld [vmem:[%s1988_s4] sm:$0xff]   ;;  %v1372_v62 = vunpack.c.l.bf16 %v1402_v55  ;;  %v1373_v0 = vunpack.c.h.bf16 %v1402_v55 }
  0x1c   : > { %1463 = vmatpush3.bf16.msra.mxu0 %v1608_v7  ;;  %v1938_v54 = vld [vmem:[%s1987_s3] ss:$0 sm:$0xff] }
  0x1d   : > { %1483 = vmatpush3.bf16.msra.mxu1 %v1609_v8  ;;  %1464 = vmatprep.subr.bf16.mxu0 %v1683_v1  ;;  %v1367_v58 = vld [vmem:[%s1933_s26] sm:$0xff]  }
  0x1e   : > { %1484 = vmatprep.subr.bf16.mxu1 %v1683_v1  ;;  %v1368_v2 = vunpack.c.l.bf16 %v1367_v58  ;;  %v1369_v7 = vunpack.c.h.bf16 %v1367_v58 }
  0x20   : > { %1465 = vmatpush3.bf16.msra.mxu0 %v1610_v9 }
  0x21   : > { %1485 = vmatpush3.bf16.msra.mxu1 %v1611_v10  ;;  %1466 = vmatprep.subr.bf16.mxu0 %v1683_v1 }
  0x22   : > { %1486 = vmatprep.subr.bf16.mxu1 %v1683_v1 }
  0x24   : > { %1467 = vmatpush3.bf16.msra.mxu0 %v1612_v11 }
  0x25   : > { %1487 = vmatpush3.bf16.msra.mxu1 %v1613_v12  ;;  %1468 = vmatprep.subr.bf16.mxu0 %v1683_v1 }
  0x26   : > { %1488 = vmatprep.subr.bf16.mxu1 %v1683_v1 }
  0x28   : > { %1469 = vmatpush3.bf16.msra.mxu0 %v1614_v13 }
  0x29   : > { %1489 = vmatpush3.bf16.msra.mxu1 %v1615_v14  ;;  %1470 = vmatprep.subr.bf16.mxu0 %v1683_v1 }
  0x2a   : > { %1490 = vmatprep.subr.bf16.mxu1 %v1683_v1 }
  0x2c   : > { %1471 = vmatpush3.bf16.msra.mxu0 %v1616_v15 }
  0x2d   : > { %1491 = vmatpush3.bf16.msra.mxu1 %v1617_v16 }
  0x2f   : > { %1473 = vmatmul.mubr.bf16.vlgmr.msra.gmra.mxu0 %v1826_v17 }
  0x30   : > { %1493 = vmatmul.mubr.bf16.vlgmr.msra.gmra.mxu1 %v1826_v17  ;;  %1498 = vmatprep.mubr.msk.bf16.mxu0 %vm545_vm1, %v1619_v18 }
  0x31   : > { %1504 = vmatprep.mubr.msk.bf16.mxu1 %vm545_vm1, %v1620_v19 }
  0xef   : > { %v411_v20 = vpop.f32.mrf.mxu0 }
  0xf0   : > { %v522_v21 = vpop.f32.mrf.mxu1 }
  0xf1   : > { %v1474_v22 = vpop.f32.mrf.mxu0 }
  0xf2   : > { %v1494_v23 = vpop.f32.mrf.mxu1 }
  0xf3   : > { %v414_v24 = vpop.f32.mrf.mxu0 }
  0xf4   : > { %v422_v25 = vpack.c.bf16 %v414_v24, %v411_v20  ;;  %v525_v26 = vpop.f32.mrf.mxu1 }
  0xf5   : > { %v534_v27 = vpack.c.bf16 %v525_v26, %v522_v21  ;;  %v1475_v28 = vpop.f32.mrf.mxu0  ;;  %v1642_v26 = vld [vmem:[%s1988_s4 + $0x8] sm:$0xff]  }
  0xf6   : > { %v1495_v29 = vpop.f32.mrf.mxu1  ;;  %1502 = vmatprep.subr.bf16.mxu1 %v422_v25 }
  0xf7   : > { %1496 = vmatprep.subr.bf16.mxu0 %v534_v27  ;;  %1503 = vmatpush3.bf16.msra.mxu1 %v422_v25  ;;  %v1641_v25 = vld [vmem:[%s1988_s4 + $0x18] sm:$0xff]  }
  0xf8   : > { %1497 = vmatpush3.bf16.msra.mxu0 %v534_v27  ;;  %1528 = vmatprep.subr.bf16.mxu1 %v1683_v1 }
  0xf9   : > { %1508 = vmatprep.subr.bf16.mxu0 %v1683_v1 }
  0xfa   : > { %1505 = vmatmul.mubr.msk.bf16.vlgmr.msra.gmra.mxu1 %vm545_vm1, %v1622_v30 }
  0xfb   : > { %1499 = vmatmul.mubr.msk.bf16.vlgmr.msra.gmra.mxu0 %vm545_vm1, %v1621_v31  ;;  %1529 = vmatpush3.bf16.msra.mxu1 %v1624_v32  ;;  %v1405_v31 = vld [vmem:[%s1933_s26 + $0x18] sm:$0xff]  }
  0xfc   : > { %1509 = vmatpush3.bf16.msra.mxu0 %v1623_v33  ;;  %1530 = vmatprep.subr.bf16.mxu1 %v1683_v1 }
  0xfd   : > { %1510 = vmatprep.subr.bf16.mxu0 %v1683_v1  ;;  %1524 = vmatprep.mubr.msk.bf16.mxu0 %vm1684_vm0, %v1683_v1 }
  0xfe   : > { %1544 = vmatprep.mubr.msk.bf16.mxu1 %vm1684_vm0, %v1683_v1 }
  0xff   : > { %1531 = vmatpush3.bf16.msra.mxu1 %v1626_v34  ;;  %v1404_v34 = vld [vmem:[%s1933_s26 + $0x10] sm:$0xff]  }
 0x100   : > { %1511 = vmatpush3.bf16.msra.mxu0 %v1625_v35  ;;  %1532 = vmatprep.subr.bf16.mxu1 %v1683_v1 }
 0x101   : > { %1512 = vmatprep.subr.bf16.mxu0 %v1683_v1 }
 0x103   : > { %1533 = vmatpush3.bf16.msra.mxu1 %v1628_v36 }
 0x104   : > { %1513 = vmatpush3.bf16.msra.mxu0 %v1627_v37  ;;  %1534 = vmatprep.subr.bf16.mxu1 %v1683_v1 }
 0x105   : > { %1514 = vmatprep.subr.bf16.mxu0 %v1683_v1 }
 0x107   : > { %1535 = vmatpush3.bf16.msra.mxu1 %v1630_v38  ;;  %v1390_v38 = vunpack.c.l.bf16 %v1405_v31 }
 0x108   : > { %1515 = vmatpush3.bf16.msra.mxu0 %v1629_v39  ;;  %1536 = vmatprep.subr.bf16.mxu1 %v1683_v1 }
 0x109   : > { %1516 = vmatprep.subr.bf16.mxu0 %v1683_v1 }
 0x10b   : > { %1537 = vmatpush3.bf16.msra.mxu1 %v1632_v40  ;;  %v1391_v40 = vunpack.c.h.bf16 %v1405_v31 }
 0x10c   : > { %1517 = vmatpush3.bf16.msra.mxu0 %v1631_v41  ;;  %1538 = vmatprep.subr.bf16.mxu1 %v1683_v1 }
 0x10d   : > { %1518 = vmatprep.subr.bf16.mxu0 %v1683_v1 }
 0x10f   : > { %1539 = vmatpush3.bf16.msra.mxu1 %v1634_v42  ;;  %v1386_v42 = vunpack.c.l.bf16 %v1404_v34 }
 0x110   : > { %1519 = vmatpush3.bf16.msra.mxu0 %v1633_v43  ;;  %1540 = vmatprep.subr.bf16.mxu1 %v1683_v1 }
 0x111   : > { %1520 = vmatprep.subr.bf16.mxu0 %v1683_v1 }
 0x113   : > { %1541 = vmatpush3.bf16.msra.mxu1 %v1636_v44 }
 0x114   : > { %1521 = vmatpush3.bf16.msra.mxu0 %v1635_v45  ;;  %1542 = vmatprep.subr.bf16.mxu1 %v1683_v1 }
 0x115   : > { %1522 = vmatprep.subr.bf16.mxu0 %v1683_v1 }
 0x117   : > { %1543 = vmatpush3.bf16.msra.mxu1 %v1638_v46 }
 0x118   : > { %1523 = vmatpush3.bf16.msra.mxu0 %v1637_v47  ;;  %v1387_v47 = vunpack.c.h.bf16 %v1404_v34 }
 0x11a   : > { %1545 = vmatmul.mubr.bf16.vlgmr.msra.gmra.mxu1 %v1826_v17 }
 0x11b   : > { %1525 = vmatmul.mubr.bf16.vlgmr.msra.gmra.mxu0 %v1826_v17  ;;  %1556 = vmatprep.mubr.msk.bf16.mxu1 %vm545_vm1, %v1640_v49 }
 0x11c   : > { %1550 = vmatprep.mubr.msk.bf16.mxu0 %vm545_vm1, %v1639_v48 }
 0x1ba   : > { %v1506_v50 = vpop.f32.mrf.mxu1 }
 0x1bb   : > { %v1500_v51 = vpop.f32.mrf.mxu0 }
 0x1bc   : > { %v660_v52 = vadd.f32 %v1506_v50, %v1500_v51  ;;  %v651_v53 = vpop.f32.mrf.mxu1 }
 0x1bd   : > { %v586_v56 = vpop.f32.mrf.mxu0 }
 0x1be   : > { %v652_v57 = vadd.f32 %v651_v53, %v586_v56  ;;  %v1507_v59 = vpop.f32.mrf.mxu1  ;;  %v674_v61 = vadd.f32 %v1938_v54, %v660_v52 }
 0x1bf   : > { %v1501_v60 = vpop.f32.mrf.mxu0 }
 0x1c0   : > { %v663_v63 = vadd.f32 %v1507_v59, %v1501_v60  ;;  %v654_v1 = vpop.f32.mrf.mxu1  ;;  %v672_v4 = vadd.f32 %v1938_v54, %v652_v57  ;;  %v686_v8 = vadd.f32 %v1372_v62, %v674_v61 }
 0x1c1   : > { %v589_v3 = vpop.f32.mrf.mxu0 }
 0x1c2   : > { %v675_v5 = vadd.f32 %v1938_v54, %v663_v63  ;;  %v655_v6 = vadd.f32 %v654_v1, %v589_v3  ;;  %v684_v11 = vadd.f32 %v1368_v2, %v672_v4 }
 0x1c4   : > { %v687_v9 = vadd.f32 %v1373_v0, %v675_v5  ;;  %v673_v10 = vadd.f32 %v1938_v54, %v655_v6 }
 0x1c6   : > { %v1382_v12 = vpack.c.bf16 %v687_v9, %v686_v8  ;;  %v685_v13 = vadd.f32 %v1369_v7, %v673_v10 }
 0x1c8   : > { %1403 = vst [vmem:[%s1949_s29 + $0x8] sm:$0xff] %v1382_v12   ;;  %v1377_v14 = vpack.c.bf16 %v685_v13, %v684_v11 }
 0x1ca   : > { %1378 = vst [vmem:[%s1949_s29] sm:$0xff] %v1377_v14  }
 0x1da   : > { %v918_v15 = vpop.f32.mrf.mxu1 }
 0x1db   : > { %v807_v16 = vpop.f32.mrf.mxu0 }
 0x1dc   : > { %v1546_v17 = vpop.f32.mrf.mxu1 }
 0x1dd   : > { %v1526_v18 = vpop.f32.mrf.mxu0 }
 0x1de   : > { %v921_v19 = vpop.f32.mrf.mxu1 }
 0x1df   : > { %v810_v20 = vpop.f32.mrf.mxu0  ;;  %v929_v21 = vpack.c.bf16 %v921_v19, %v918_v15 }
 0x1e0   : > { %v818_v22 = vpack.c.bf16 %v810_v20, %v807_v16  ;;  %v1547_v23 = vpop.f32.mrf.mxu1 }
 0x1e1   : > { %v1527_v24 = vpop.f32.mrf.mxu0  ;;  %1548 = vmatprep.subr.bf16.mxu0 %v929_v21 }
 0x1e2   : > { %1554 = vmatprep.subr.bf16.mxu1 %v818_v22  ;;  %1549 = vmatpush3.bf16.msra.mxu0 %v929_v21 }
 0x1e3   : > { %1555 = vmatpush3.bf16.msra.mxu1 %v818_v22 }
 0x1e5   : > { %1551 = vmatmul.mubr.msk.bf16.vlgmr.msra.gmra.mxu0 %vm545_vm1, %v1641_v25 }
 0x1e6   : > { %1557 = vmatmul.mubr.msk.bf16.vlgmr.msra.gmra.mxu1 %vm545_vm1, %v1642_v26 }
 0x2a5   : > { %v1552_v27 = vpop.f32.mrf.mxu0 }
 0x2a6   : > { %v1558_v28 = vpop.f32.mrf.mxu1 }
 0x2a7   : > { %v1054_v29 = vadd.f32 %v1558_v28, %v1552_v27  ;;  %v980_v30 = vpop.f32.mrf.mxu0 }
 0x2a8   : > { %v1045_v32 = vpop.f32.mrf.mxu1 }
 0x2a9   : > { %v1046_v33 = vadd.f32 %v1045_v32, %v980_v30  ;;  %v1553_v35 = vpop.f32.mrf.mxu0  ;;  %v1062_v37 = vadd.f32 %v1938_v54, %v1054_v29 }
 0x2aa   : > { %v1559_v36 = vpop.f32.mrf.mxu1 }
 0x2ab   : > { %v1057_v39 = vadd.f32 %v1559_v36, %v1553_v35  ;;  %v983_v41 = vpop.f32.mrf.mxu0  ;;  %v1060_v44 = vadd.f32 %v1938_v54, %v1046_v33  ;;  %v1075_v48 = vadd.f32 %v1390_v38, %v1062_v37 }
 0x2ac   : > { %v1048_v43 = vpop.f32.mrf.mxu1 }
 0x2ad   : > { %v1063_v45 = vadd.f32 %v1938_v54, %v1057_v39  ;;  %v1049_v46 = vadd.f32 %v1048_v43, %v983_v41  ;;  %v1073_v51 = vadd.f32 %v1386_v42, %v1060_v44 }
 0x2af   : > { %v1076_v49 = vadd.f32 %v1391_v40, %v1063_v45  ;;  %v1061_v50 = vadd.f32 %v1938_v54, %v1049_v46 }
 0x2b1   : > { %v1400_v52 = vpack.c.bf16 %v1076_v49, %v1075_v48  ;;  %v1074_v53 = vadd.f32 %v1387_v47, %v1061_v50 }
 0x2b3   : > { %1407 = vst [vmem:[%s1949_s29 + $0x18] sm:$0xff] %v1400_v52   ;;  %v1395_v55 = vpack.c.bf16 %v1074_v53, %v1073_v51 }
 0x2b5   : > { %1406 = vst [vmem:[%s1949_s29 + $0x10] sm:$0xff] %v1395_v55  }
 0x2b6 PF: > { %s15_s22 = sadd.s32 1, %s1681_s22   ;;  %s1990_s18 = smov %s1673_s20 }
 0x2b7   : > { %p12_p8 = scmp.ge.s32.totalorder %s15_s22, 34   ;;  %s1991_s19 = smov %s1677_s21 }
 0x2b8   : > { %s1992_s20 = smov %s1995_s23  ;;  %s1993_s21 = smov %s1999_s24 }
 0x2b9   :  { %14 = sbr.rel (!%p12_p8) target bundleno = 3 (0x3), region = 79 }

// kernel: up_res_convolution.4
= control target key start
LH: loop header
LB: loop body
LE: loop exit
PB: predicated region body
PF: predicated region fallthrough
CT: control target
= control target key end

     0   :  { %s1550_s21 = smov 0   ;;  %s1552_s22 = smov 0   ;;  %s1730_s0 = inlined_call_operand.vmem [shape: bf16[2,34,34,128], index: 0, kind: input, shape index: {}]   ;;  %s1731_s1 = inlined_call_operand.vmem [shape: bf16[9,128,128], index: 1, kind: input, shape index: {}]   ;;  %s1732_s2 = inlined_call_operand.vmem [shape: f32[1,128], index: 2, kind: input, shape index: {}]   ;;  %s1733_s3 = inlined_call_operand.vmem [shape: bf16[128,128], index: 3, kind: input, shape index: {}]   ;;  %s1734_s4 = inlined_call_operand.vmem [shape: f32[1,128], index: 4, kind: input, shape index: {}]   ;;  %s1735_s5 = inlined_call_operand.vmem [shape: bf16[2,32,32,128], index: 5, kind: output, shape index: {0}]   ;;  %s1736_s6 = inlined_call_operand.vmem [shape: bf16[2,32,32,128], index: 6, kind: output, shape index: {1}]  }
   0x1   :  { %s1554_s23 = smov 0   ;;  %s1556_s24 = smov 0  }
   0x2   :  { %s1558_s25 = smov 0   ;;  %s1560_s26 = smov 0  }
   0x3   :  { %s1562_s27 = smov 0  }
   0x4 LB: > { %s29_s28 = sadd.s32 1, %s1500_s24  ;;  %s32_s29 = sadd.s32 1, %s1504_s25  ;;  %s1512_s27 = sphi %s1562_s27, %s17_s27   ;;  %s1508_s26 = sphi %s1560_s26, %s1748_s26   ;;  %s1504_s25 = sphi %s1558_s25, %s1747_s25   ;;  %s1500_s24 = sphi %s1556_s24, %s1746_s24   ;;  %s1496_s23 = sphi %s1554_s23, %s1745_s23   ;;  %s1492_s22 = sphi %s1552_s22, %s1744_s22   ;;  %s1488_s21 = sphi %s1550_s21, %s1743_s21  }
   0x5   : > { %p30_p0 = scmp.ge.s32.totalorder %s29_s28, 3  ;;  %p1119_p1 = scmp.ge.s32.totalorder %s1512_s27, 1 }
   0x6   : > { %p248_p2 = scmp.lt.s32.totalorder %s1512_s27, 193  ;;  %s36_s30 = sadd.s32 1, %s1508_s26 }
   0x7   : > { %s1750_s28 = smov (%p30_p0, %s29_s28), 0  ;;  %s1752_s29 = smov (!%p30_p0, %s32_s29), %s1504_s25 }
   0x8   : > { %1737 = sst [smem:[#allocation4_spill]] %s1750_s28  ;;  %p249_p3 = pnand %p1119_p1, %p248_p2 }
   0x9   : > { %p34_p4 = scmp.ge.s32.totalorder %s1752_s29, 32  ;;  %s296_s7 = sadd.s32 (!%p249_p3), %s1488_s21, %s1492_s22 }
   0xa   : > { %p297_p6 = scmp.lt.s32.totalorder (!%p249_p3), %s1496_s23, 1  ;;  %p299_p7 = scmp.lt.s32.totalorder (!%p249_p3), %s296_s7, 33 }
   0xb   : > { %s1754_s29 = smov (%p34_p4, %s1752_s29), 0  ;;  %s1756_s30 = smov (!%p34_p4, %s36_s30), %s1508_s26 }
   0xc   : > { %1738 = sst [smem:[#allocation5_spill]] %s1754_s29  ;;  %p38_p5 = scmp.ge.s32.totalorder %s1756_s30, 2 }
   0xd   : > { %252 = sbr.rel (%p249_p3) target bundleno = 550 (0x226), region = 40  ;;  %p309_p8 = scmp.lt.s32.totalorder (!%p249_p3), %s1492_s22, 31 }
   0xe   : > { %s1758_s30 = smov (%p38_p5, %s1756_s30), 0  ;;  %p1127_p9 = scmp.ne.s32.totalorder (!%p249_p3), %s1488_s21, 0 }
   0xf   : > { %1739 = sst [smem:[#allocation6_spill]] %s1758_s30 }
  0x12   : > { %s1760_s23 = smov (!%p297_p6, %s1496_s23), 1  ;;  %s1762_s7 = smov (!%p299_p7, %s296_s7), 33 }
  0x13   : > { %s1365_s8 = smul.u32 170, %s1760_s23  ;;  %s1122_s10 = sshll.u32 %s1760_s23, 7 }
  0x14   : > { %s1364_s9 = smul.u32 5, %s1762_s7  ;;  %s1764_s22 = smov (!%p309_p8, %s1492_s22), 31 }
  0x15   : > { %s1121_s13 = sshll.u32 %s1764_s22, 2  ;;  %329 = sbr.rel (%p1127_p9) target bundleno = 29 (0x1d), region = 44 }
  0x16   : > { %s303_s11 = sadd.s32 %s1365_s8, %s1364_s9  ;;  %s313_s17 = sadd.s32 %s1122_s10, %s1121_s13 }
  0x17   : > { %s1120_s12 = sshll.u32 %s303_s11, 2  ;;  %s1123_s18 = sshll.u32 %s313_s17, 2 }
  0x18   : > { %s1603_s16 = scalar_lea.vmem %s1730_s0, %s1120_s12  ;;  %s1608_s30 = scalar_lea.vmem %s1735_s5, %s1123_s18 }
  0x19   : > { %s1613_s23 = scalar_lea.vmem %s1736_s6, %s1123_s18 }
  0x1a   : > { %v1514_v0 = vmov 0.0  }
  0x1b   : > { %330 = vst [vmem:[#allocation2 + $0x10] sm:$0xff] %v1514_v0  ;;  %331 = vst [vmem:[#allocation2] sm:$0xff] %v1514_v0 }
  0x1c   : > { %332 = vst [vmem:[#allocation2 + $0x18] sm:$0xff] %v1514_v0  ;;  %333 = vst [vmem:[#allocation2 + $0x8] sm:$0xff] %v1514_v0 }
  0x1d PF: > { %s1213_s22 = smul.u32 192, %s1488_s21  ;;  %v1618_v1 = vld [vmem:[%s1603_s16] sm:$0xff]   ;;  %v1621_v2 = vld [vmem:[%s1603_s16 + $0x8] sm:$0xff]   ;;  %vm499_vm0 = vsmask.f32 7424  ;;  %vm643_vm1 = vcmask 1046528  }
  0x1e   : > { %1300 = vmatprep.mubr.bf16.mxu0 %v1618_v1  ;;  %v501_v3 = vshrl.u32 %v1618_v1, 16  ;;  %v503_v4 = vshll.u32 %v1618_v1, 16  ;;  %v508_v6 = vshll.u32 %v1621_v2, 16  ;;  %v1442_v22 = vld [vmem:[%s1603_s16 + $0x10] ss:$0 sps:$4 sm:$0x11]  }
  0x1f   : > { %s1626_s7 = scalar_lea.vmem %s1731_s1, %s1213_s22  ;;  %v512_v26 = vshrl.u32 %v1621_v2, 16  ;;  %v516_v27 = vshll.u32 %v1442_v22, 16  ;;  %v644_v32 = vrot.slane %v1618_v1, 1  ;;  %v645_v33 = vrot.slane %v1621_v2, 1  ;;  %p1191_p10 = scmp.ne.s32.totalorder %s1488_s21, 1 }
  0x20   : > { %v1423_v5 = vld [vmem:[%s1626_s7 + $0x38] sm:$0xff]   ;;  %v505_v8 = vrot.slane %v503_v4, 1  ;;  %v1425_v9 = vld [vmem:[%s1626_s7 + $0x30] sm:$0xff]   ;;  %v510_v10 = vrot.slane %v508_v6, 1  ;;  %v1427_v13 = vld [vmem:[%s1626_s7 + $0x28] sm:$0xff]   ;;  %v647_v43 = vrot.slane %v1442_v22, 1 }
  0x21   : > { %v1424_v7 = vld [vmem:[%s1626_s7 + $0x78] sm:$0xff]   ;;  %1284 = vmatprep.subr.bf16.mxu0 %v1423_v5  ;;  %v1426_v11 = vld [vmem:[%s1626_s7 + $0x70] sm:$0xff]   ;;  %v1428_v14 = vld [vmem:[%s1626_s7 + $0x68] sm:$0xff]   ;;  %v518_v31 = vrot.slane %v516_v27, 1  ;;  %v646_v36 = vsel %vm643_vm1, %v644_v32, %v645_v33 }
  0x22   : > { %1285 = vmatpush3.bf16.msra.mxu0 %v1423_v5  ;;  %1304 = vmatprep.subr.bf16.mxu1 %v1424_v7  ;;  %v506_v12 = vor.u32 %v505_v8, %v501_v3  ;;  %v1429_v16 = vld [vmem:[%s1626_s7 + $0x20] sm:$0xff]   ;;  %v1431_v18 = vld [vmem:[%s1626_s7 + $0x18] sm:$0xff]   ;;  %v1433_v20 = vld [vmem:[%s1626_s7 + $0x10] sm:$0xff]   ;;  %v514_v30 = vor.u32 %v512_v26, %v510_v10  ;;  %v648_v44 = vsel %vm643_vm1, %v645_v33, %v647_v43 }
  0x23   : > { %1305 = vmatpush3.bf16.msra.mxu1 %v1424_v7  ;;  %1286 = vmatprep.subr.bf16.mxu0 %v1425_v9  ;;  %v1430_v17 = vld [vmem:[%s1626_s7 + $0x60] sm:$0xff]   ;;  %v1432_v19 = vld [vmem:[%s1626_s7 + $0x58] sm:$0xff]   ;;  %v1434_v21 = vld [vmem:[%s1626_s7 + $0x50] sm:$0xff]  }
  0x24   : > { %1306 = vmatprep.subr.bf16.mxu1 %v1426_v11  ;;  %v1639_v15 = vsel %vm499_vm0, %v506_v12, %v510_v10  ;;  %v1435_v23 = vld [vmem:[%s1626_s7 + $0x8] sm:$0xff]   ;;  %v1437_v25 = vld [vmem:[%s1626_s7] sm:$0xff]   ;;  %v1441_v29 = vld [vmem:[%s1626_s7 + $0xb8] sm:$0xff]   ;;  %v1658_v34 = vsel %vm499_vm0, %v514_v30, %v518_v31 }
  0x25   : > { %1320 = vmatprep.mubr.bf16.mxu1 %v1639_v15  ;;  %v1436_v24 = vld [vmem:[%s1626_s7 + $0x48] sm:$0xff]   ;;  %v1438_v28 = vld [vmem:[%s1626_s7 + $0x40] sm:$0xff]   ;;  %v1443_v35 = vld [vmem:[%s1626_s7 + $0xb0] sm:$0xff]  }
  0x26   : > { %1287 = vmatpush3.bf16.msra.mxu0 %v1425_v9  ;;  %v1444_v37 = vld [vmem:[%s1626_s7 + $0xa8] sm:$0xff]   ;;  %v1445_v38 = vld [vmem:[%s1626_s7 + $0xa0] sm:$0xff]   ;;  %v1446_v39 = vld [vmem:[%s1626_s7 + $0x98] sm:$0xff]  }
  0x27   : > { %1307 = vmatpush3.bf16.msra.mxu1 %v1426_v11  ;;  %1288 = vmatprep.subr.bf16.mxu0 %v1427_v13  ;;  %v1447_v40 = vld [vmem:[%s1626_s7 + $0x90] sm:$0xff]   ;;  %v1448_v41 = vld [vmem:[%s1626_s7 + $0x88] sm:$0xff]   ;;  %v1449_v42 = vld [vmem:[%s1626_s7 + $0x80] sm:$0xff]  }
  0x28   : > { %1308 = vmatprep.subr.bf16.mxu1 %v1428_v14  ;;  %v341_v48 = vld [vmem:[#allocation2 + $0x18] sm:$0xff]  ;;  %v339_v49 = vld [vmem:[#allocation2 + $0x10] sm:$0xff]  ;;  %v342_v53 = vld [vmem:[#allocation2 + $0x8] sm:$0xff] }
  0x29   : > { %v340_v55 = vld [vmem:[#allocation2] sm:$0xff] }
  0x2a   : > { %1289 = vmatpush3.bf16.msra.mxu0 %v1427_v13 }
  0x2b   : > { %1309 = vmatpush3.bf16.msra.mxu1 %v1428_v14  ;;  %1290 = vmatprep.subr.bf16.mxu0 %v1429_v16 }
  0x2c   : > { %1310 = vmatprep.subr.bf16.mxu1 %v1430_v17 }
  0x2e   : > { %1291 = vmatpush3.bf16.msra.mxu0 %v1429_v16 }
  0x2f   : > { %1311 = vmatpush3.bf16.msra.mxu1 %v1430_v17  ;;  %1292 = vmatprep.subr.bf16.mxu0 %v1431_v18 }
  0x30   : > { %1312 = vmatprep.subr.bf16.mxu1 %v1432_v19 }
  0x32   : > { %1293 = vmatpush3.bf16.msra.mxu0 %v1431_v18 }
  0x33   : > { %1313 = vmatpush3.bf16.msra.mxu1 %v1432_v19  ;;  %1294 = vmatprep.subr.bf16.mxu0 %v1433_v20 }
  0x34   : > { %1314 = vmatprep.subr.bf16.mxu1 %v1434_v21 }
  0x36   : > { %1295 = vmatpush3.bf16.msra.mxu0 %v1433_v20 }
  0x37   : > { %1315 = vmatpush3.bf16.msra.mxu1 %v1434_v21  ;;  %1296 = vmatprep.subr.bf16.mxu0 %v1435_v23 }
  0x38   : > { %1316 = vmatprep.subr.bf16.mxu1 %v1436_v24 }
  0x3a   : > { %1297 = vmatpush3.bf16.msra.mxu0 %v1435_v23 }
  0x3b   : > { %1317 = vmatpush3.bf16.msra.mxu1 %v1436_v24  ;;  %1298 = vmatprep.subr.bf16.mxu0 %v1437_v25 }
  0x3c   : > { %1318 = vmatprep.subr.bf16.mxu1 %v1438_v28 }
  0x3e   : > { %1299 = vmatpush3.bf16.msra.mxu0 %v1437_v25 }
  0x3f   : > { %1319 = vmatpush3.bf16.msra.mxu1 %v1438_v28  ;;  %1324 = vmatprep.subr.bf16.mxu0 %v1441_v29 }
  0x41   : > { %1301 = vmatmul.mubr.bf16.vlgmr.msra.gmra.mxu0 %v1621_v2 }
  0x42   : > { %1325 = vmatpush3.bf16.msra.mxu0 %v1441_v29  ;;  %1321 = vmatmul.mubr.bf16.vlgmr.msra.gmra.mxu1 %v1658_v34 }
  0x43   : > { %1326 = vmatprep.subr.bf16.mxu0 %v1443_v35  ;;  %1340 = vmatprep.mubr.bf16.mxu0 %v646_v36 }
  0x46   : > { %1327 = vmatpush3.bf16.msra.mxu0 %v1443_v35 }
  0x47   : > { %1328 = vmatprep.subr.bf16.mxu0 %v1444_v37 }
  0x4a   : > { %1329 = vmatpush3.bf16.msra.mxu0 %v1444_v37 }
  0x4b   : > { %1330 = vmatprep.subr.bf16.mxu0 %v1445_v38 }
  0x4e   : > { %1331 = vmatpush3.bf16.msra.mxu0 %v1445_v38 }
  0x4f   : > { %1332 = vmatprep.subr.bf16.mxu0 %v1446_v39 }
  0x52   : > { %1333 = vmatpush3.bf16.msra.mxu0 %v1446_v39 }
  0x53   : > { %1334 = vmatprep.subr.bf16.mxu0 %v1447_v40 }
  0x56   : > { %1335 = vmatpush3.bf16.msra.mxu0 %v1447_v40 }
  0x57   : > { %1336 = vmatprep.subr.bf16.mxu0 %v1448_v41 }
  0x5a   : > { %1337 = vmatpush3.bf16.msra.mxu0 %v1448_v41 }
  0x5b   : > { %1338 = vmatprep.subr.bf16.mxu0 %v1449_v42 }
  0x5e   : > { %1339 = vmatpush3.bf16.msra.mxu0 %v1449_v42 }
  0x61   : > { %1341 = vmatmul.mubr.bf16.vlgmr.msra.gmra.mxu0 %v648_v44 }
 0x101   : > { %v1302_v45 = vpop.f32.mrf.mxu0 }
 0x102   : > { %v1322_v47 = vpop.f32.mrf.mxu1  ;;  %v474_v52 = vadd.f32 %v1302_v45, %v341_v48 }
 0x103   : > { %v457_v46 = vpop.f32.mrf.mxu0 }
 0x104   : > { %v604_v51 = vpop.f32.mrf.mxu1  ;;  %v472_v54 = vadd.f32 %v457_v46, %v339_v49  ;;  %v621_v58 = vadd.f32 %v1322_v47, %v474_v52 }
 0x105   : > { %v1303_v50 = vpop.f32.mrf.mxu0 }
 0x106   : > { %v1323_v57 = vpop.f32.mrf.mxu1  ;;  %v475_v59 = vadd.f32 %v1303_v50, %v342_v53  ;;  %v619_v61 = vadd.f32 %v604_v51, %v472_v54 }
 0x107   : > { %v460_v56 = vpop.f32.mrf.mxu0 }
 0x108   : > { %v473_v62 = vadd.f32 %v460_v56, %v340_v55  ;;  %v607_v0 = vpop.f32.mrf.mxu1  ;;  %v622_v2 = vadd.f32 %v1323_v57, %v475_v59 }
 0x10a   : > { %v620_v5 = vadd.f32 %v607_v0, %v473_v62 }
 0x121   : > { %v1342_v60 = vpop.f32.mrf.mxu0 }
 0x122   : > { %v750_v63 = vadd.f32 %v1342_v60, %v621_v58 }
 0x123   : > { %v733_v1 = vpop.f32.mrf.mxu0 }
 0x124   : > { %754 = vst [vmem:[#allocation2 + $0x18] sm:$0xff] %v750_v63  ;;  %v748_v3 = vadd.f32 %v733_v1, %v619_v61 }
 0x125   : > { %v1343_v4 = vpop.f32.mrf.mxu0 }
 0x126   : > { %752 = vst [vmem:[#allocation2 + $0x10] sm:$0xff] %v748_v3  ;;  %v751_v6 = vadd.f32 %v1343_v4, %v622_v2  ;;  %759 = sbr.rel (%p1191_p10) target bundleno = 534 (0x216), region = 48 }
 0x127   : > { %v736_v7 = vpop.f32.mrf.mxu0 }
 0x128   : > { %755 = vst [vmem:[#allocation2 + $0x8] sm:$0xff] %v751_v6  ;;  %v749_v8 = vadd.f32 %v736_v7, %v620_v5 }
 0x12a   : > { %753 = vst [vmem:[#allocation2] sm:$0xff] %v749_v8 }
 0x12b   : > { %v1450_v9 = vld [vmem:[%s1733_s3 + $0x38] sm:$0xff]   ;;  %1360 = vmatprep.mubr.bf16.mxu0 %v1639_v15  ;;  %v1451_v10 = vld [vmem:[%s1733_s3 + $0x30] sm:$0xff]   ;;  %v1452_v11 = vld [vmem:[%s1733_s3 + $0x28] sm:$0xff]  }
 0x12c   : > { %1344 = vmatprep.subr.bf16.mxu0 %v1450_v9  ;;  %v1453_v12 = vld [vmem:[%s1733_s3 + $0x20] sm:$0xff]   ;;  %v1454_v13 = vld [vmem:[%s1733_s3 + $0x18] sm:$0xff]   ;;  %v1455_v14 = vld [vmem:[%s1733_s3 + $0x10] sm:$0xff]  }
 0x12d   : > { %1345 = vmatpush3.bf16.msra.mxu0 %v1450_v9  ;;  %v1456_v15 = vld [vmem:[%s1733_s3 + $0x8] sm:$0xff]   ;;  %v1457_v16 = vld [vmem:[%s1733_s3] sm:$0xff]  }
 0x12e   : > { %1346 = vmatprep.subr.bf16.mxu0 %v1451_v10  ;;  %v1192_v17 = vld [vmem:[%s1734_s4] ss:$0 sm:$0xff] }
 0x131   : > { %1347 = vmatpush3.bf16.msra.mxu0 %v1451_v10 }
 0x132   : > { %1348 = vmatprep.subr.bf16.mxu0 %v1452_v11 }
 0x135   : > { %1349 = vmatpush3.bf16.msra.mxu0 %v1452_v11 }
 0x136   : > { %1350 = vmatprep.subr.bf16.mxu0 %v1453_v12 }
 0x139   : > { %1351 = vmatpush3.bf16.msra.mxu0 %v1453_v12 }
 0x13a   : > { %1352 = vmatprep.subr.bf16.mxu0 %v1454_v13 }
 0x13d   : > { %1353 = vmatpush3.bf16.msra.mxu0 %v1454_v13 }
 0x13e   : > { %1354 = vmatprep.subr.bf16.mxu0 %v1455_v14 }
 0x141   : > { %1355 = vmatpush3.bf16.msra.mxu0 %v1455_v14 }
 0x142   : > { %1356 = vmatprep.subr.bf16.mxu0 %v1456_v15 }
 0x145   : > { %1357 = vmatpush3.bf16.msra.mxu0 %v1456_v15 }
 0x146   : > { %1358 = vmatprep.subr.bf16.mxu0 %v1457_v16 }
 0x149   : > { %1359 = vmatpush3.bf16.msra.mxu0 %v1457_v16 }
 0x14c   : > { %1361 = vmatmul.mubr.bf16.vlgmr.msra.gmra.mxu0 %v1658_v34 }
 0x20c   : > { %v1362_v18 = vpop.f32.mrf.mxu0 }
 0x20d   : > { %v874_v19 = vadd.f32 %v1362_v18, %v1192_v17 }
 0x20e   : > { %v865_v20 = vpop.f32.mrf.mxu0 }
 0x20f   : > { %882 = vst [vmem:[#allocation3 + $0x8] sm:$0xff] %v874_v19  ;;  %v866_v21 = vadd.f32 %v1192_v17, %v865_v20 }
 0x210   : > { %v1363_v22 = vpop.f32.mrf.mxu0 }
 0x211   : > { %880 = vst [vmem:[#allocation3] sm:$0xff] %v866_v21  ;;  %v877_v23 = vadd.f32 %v1363_v22, %v1192_v17 }
 0x212   : > { %v868_v24 = vpop.f32.mrf.mxu0 }
 0x213   : > { %883 = vst [vmem:[#allocation3 + $0x10] sm:$0xff] %v877_v23  ;;  %v869_v25 = vadd.f32 %v1192_v17, %v868_v24 }
 0x215   : > { %881 = vst [vmem:[#allocation3 + $0x18] sm:$0xff] %v869_v25 }
 0x216 PF: > { %p1201_p11 = scmp.ne.s32.totalorder %s1488_s21, 2 }
 0x218   : > { %887 = sbr.rel (%p1201_p11) target bundleno = 550 (0x226), region = 52 }
 0x21d   : > { %v888_v26 = vld [vmem:[#allocation2 + $0x10] sm:$0xff]  ;;  %v889_v27 = vld [vmem:[#allocation2] sm:$0xff]  ;;  %v890_v31 = vld [vmem:[#allocation2 + $0x18] sm:$0xff] }
 0x21e   : > { %v1202_v28 = vld [vmem:[%s1732_s2] ss:$0 sm:$0xff]  ;;  %v891_v32 = vld [vmem:[#allocation2 + $0x8] sm:$0xff]  ;;  %v928_v36 = vld [vmem:[#allocation3 + $0x18] sm:$0xff] }
 0x21f   : > { %v899_v29 = vadd.f32 %v1202_v28, %v888_v26  ;;  %v900_v30 = vadd.f32 %v1202_v28, %v889_v27  ;;  %v927_v33 = vld [vmem:[#allocation3] sm:$0xff]  ;;  %v901_v34 = vadd.f32 %v1202_v28, %v890_v31  ;;  %v902_v35 = vadd.f32 %v1202_v28, %v891_v32  ;;  %v929_v37 = vld [vmem:[#allocation3 + $0x8] sm:$0xff]  ;;  %v930_v38 = vld [vmem:[#allocation3 + $0x10] sm:$0xff] }
 0x220   : > { %v1235_v41 = vpack.c.bf16 %v928_v36, %v927_v33  ;;  %v1240_v42 = vpack.c.bf16 %v930_v38, %v929_v37 }
 0x221   : > { %v903_v39 = vmax.f32 %v899_v29, 0.0  ;;  %v904_v40 = vmax.f32 %v900_v30, 0.0  ;;  %v905_v43 = vmax.f32 %v901_v34, 0.0  ;;  %v906_v44 = vmax.f32 %v902_v35, 0.0 }
 0x222   : > { %1236 = vst [vmem:[%s1613_s23] sm:$0xff] %v1235_v41   ;;  %1243 = vst [vmem:[%s1613_s23 + $0x8] sm:$0xff] %v1240_v42  }
 0x223   : > { %v1225_v45 = vpack.c.bf16 %v904_v40, %v903_v39  ;;  %v1230_v46 = vpack.c.bf16 %v906_v44, %v905_v43 }
 0x225   : > { %1226 = vst [vmem:[%s1608_s30] sm:$0xff] %v1225_v45   ;;  %1242 = vst [vmem:[%s1608_s30 + $0x8] sm:$0xff] %v1230_v46  }
 0x226 PF: > { %s17_s27 = sadd.s32 1, %s1512_s27   ;;  %s1740_s11 = sld [smem:[#allocation4_spill]] }
 0x227   : > { %p14_p12 = scmp.ge.s32.totalorder %s17_s27, 194   ;;  %s1741_s12 = sld [smem:[#allocation5_spill]] }
 0x228   : > { %s1742_s13 = sld [smem:[#allocation6_spill]]  ;;  %s1743_s21 = smov %s1500_s24 }
 0x229   : > { %s1744_s22 = smov %s1504_s25  ;;  %s1745_s23 = smov %s1508_s26 }
 0x22a   :  { %16 = sbr.rel (!%p14_p12) target bundleno = 4 (0x4), region = 97 }
 0x22c   : > { %s1746_s24 = smov %s1740_s11 }
 0x22d   : > { %s1747_s25 = smov %s1741_s12 }
 0x22e   : > { %s1748_s26 = smov %s1742_s13 }

// kernel: up_res_convolution.5
= control target key start
LH: loop header
LB: loop body
LE: loop exit
PB: predicated region body
PF: predicated region fallthrough
CT: control target
= control target key end

     0   :  { %s1232_s15 = smov 0   ;;  %s1234_s16 = smov 0   ;;  %s1378_s0 = inlined_call_operand.vmem [shape: bf16[2,34,34,128], index: 0, kind: input, shape index: {}]   ;;  %s1379_s1 = inlined_call_operand.vmem [shape: bf16[2,32,32,128], index: 1, kind: input, shape index: {}]   ;;  %s1380_s2 = inlined_call_operand.vmem [shape: bf16[9,128,128], index: 2, kind: input, shape index: {}]   ;;  %s1381_s3 = inlined_call_operand.vmem [shape: f32[1,128], index: 3, kind: input, shape index: {}]   ;;  %s1382_s4 = inlined_call_operand.vmem [shape: f32[2,32,32,128], index: 4, kind: output, shape index: {}]  }
   0x1   :  { %s1236_s17 = smov 0   ;;  %s1238_s18 = smov 0  }
   0x2   :  { %s1240_s19 = smov 0   ;;  %s1242_s20 = smov 0  }
   0x3   :  { %s1244_s21 = smov 0  }
   0x4 LB: > { %s26_s22 = sadd.s32 1, %s1192_s18  ;;  %s29_s23 = sadd.s32 1, %s1196_s19  ;;  %s1204_s21 = sphi %s1244_s21, %s14_s21   ;;  %s1200_s20 = sphi %s1242_s20, %s1390_s20   ;;  %s1196_s19 = sphi %s1240_s19, %s1389_s19   ;;  %s1192_s18 = sphi %s1238_s18, %s1388_s18   ;;  %s1188_s17 = sphi %s1236_s17, %s1387_s17   ;;  %s1184_s16 = sphi %s1234_s16, %s1386_s16   ;;  %s1180_s15 = sphi %s1232_s15, %s1385_s15  }
   0x5   : > { %p27_p0 = scmp.ge.s32.totalorder %s26_s22, 3  ;;  %p888_p1 = scmp.ge.s32.totalorder %s1204_s21, 1 }
   0x6   : > { %p209_p2 = scmp.lt.s32.totalorder %s1204_s21, 193  ;;  %s33_s24 = sadd.s32 1, %s1200_s20 }
   0x7   : > { %s1392_s22 = smov (%p27_p0, %s26_s22), 0  ;;  %s1394_s23 = smov (!%p27_p0, %s29_s23), %s1196_s19 }
   0x8   : > { %p210_p3 = pnand %p888_p1, %p209_p2  ;;  %p31_p4 = scmp.ge.s32.totalorder %s1394_s23, 32 }
   0x9   : > { %s253_s25 = sadd.s32 (!%p210_p3), %s1180_s15, %s1184_s16  ;;  %p254_p6 = scmp.lt.s32.totalorder (!%p210_p3), %s1188_s17, 1 }
   0xa   : > { %s1396_s23 = smov (%p31_p4, %s1394_s23), 0  ;;  %s1398_s24 = smov (!%p31_p4, %s33_s24), %s1200_s20 }
   0xb   : > { %p35_p5 = scmp.ge.s32.totalorder %s1398_s24, 2  ;;  %213 = sbr.rel (%p210_p3) target bundleno = 311 (0x137), region = 36 }
   0xc   : > { %p256_p7 = scmp.lt.s32.totalorder (!%p210_p3), %s253_s25, 33  ;;  %p266_p8 = scmp.lt.s32.totalorder (!%p210_p3), %s1184_s16, 31 }
   0xd   : > { %s1400_s24 = smov (%p35_p5, %s1398_s24), 0  ;;  %p896_p9 = scmp.ne.s32.totalorder (!%p210_p3), %s1180_s15, 0 }
   0xe   : > { %1383 = sst [smem:[#allocation3_spill]] %s1400_s24 }
  0x10   : > { %s1402_s17 = smov (!%p254_p6, %s1188_s17), 1  ;;  %s1404_s25 = smov (!%p256_p7, %s253_s25), 33 }
  0x11   : > { %s1065_s26 = smul.u32 170, %s1402_s17  ;;  %s891_s28 = sshll.u32 %s1402_s17, 7 }
  0x12   : > { %s1064_s27 = smul.u32 5, %s1404_s25  ;;  %s1406_s16 = smov (!%p266_p8, %s1184_s16), 31 }
  0x13   : > { %s890_s5 = sshll.u32 %s1406_s16, 2  ;;  %286 = sbr.rel (%p896_p9) target bundleno = 27 (0x1b), region = 40 }
  0x14   : > { %s260_s29 = sadd.s32 %s1065_s26, %s1064_s27  ;;  %s270_s9 = sadd.s32 %s891_s28, %s890_s5 }
  0x15   : > { %s889_s30 = sshll.u32 %s260_s29, 2  ;;  %s892_s10 = sshll.u32 %s270_s9, 2 }
  0x16   : > { %s1285_s8 = scalar_lea.vmem %s1378_s0, %s889_s30  ;;  %s895_s11 = sshll.u32 %s270_s9, 3 }
  0x17   : > { %s1290_s14 = scalar_lea.vmem %s1379_s1, %s892_s10  ;;  %s1295_s17 = scalar_lea.vmem %s1382_s4, %s895_s11 }
  0x18   : > { %v1206_v0 = vmov 0.0  }
  0x19   : > { %287 = vst [vmem:[#allocation2 + $0x10] sm:$0xff] %v1206_v0  ;;  %288 = vst [vmem:[#allocation2] sm:$0xff] %v1206_v0 }
  0x1a   : > { %289 = vst [vmem:[#allocation2 + $0x18] sm:$0xff] %v1206_v0  ;;  %290 = vst [vmem:[#allocation2 + $0x8] sm:$0xff] %v1206_v0 }
  0x1b PF: > { %s964_s16 = smul.u32 192, %s1180_s15  ;;  %v1300_v1 = vld [vmem:[%s1285_s8] sm:$0xff]   ;;  %v1303_v2 = vld [vmem:[%s1285_s8 + $0x8] sm:$0xff]   ;;  %vm456_vm0 = vsmask.f32 7424  ;;  %vm600_vm1 = vcmask 1046528  }
  0x1c   : > { %1020 = vmatprep.mubr.bf16.mxu0 %v1300_v1  ;;  %v458_v3 = vshrl.u32 %v1300_v1, 16  ;;  %v460_v4 = vshll.u32 %v1300_v1, 16  ;;  %v465_v6 = vshll.u32 %v1303_v2, 16  ;;  %v1142_v22 = vld [vmem:[%s1285_s8 + $0x10] ss:$0 sps:$4 sm:$0x11]  }
  0x1d   : > { %s1308_s27 = scalar_lea.vmem %s1380_s2, %s964_s16  ;;  %v469_v26 = vshrl.u32 %v1303_v2, 16  ;;  %v473_v27 = vshll.u32 %v1142_v22, 16  ;;  %v601_v32 = vrot.slane %v1300_v1, 1  ;;  %v602_v33 = vrot.slane %v1303_v2, 1  ;;  %p960_p10 = scmp.ne.s32.totalorder %s1180_s15, 2 }
  0x1e   : > { %v1123_v5 = vld [vmem:[%s1308_s27 + $0x38] sm:$0xff]   ;;  %v462_v8 = vrot.slane %v460_v4, 1  ;;  %v1125_v9 = vld [vmem:[%s1308_s27 + $0x30] sm:$0xff]   ;;  %v467_v10 = vrot.slane %v465_v6, 1  ;;  %v1127_v13 = vld [vmem:[%s1308_s27 + $0x28] sm:$0xff]   ;;  %v604_v43 = vrot.slane %v1142_v22, 1 }
  0x1f   : > { %v1124_v7 = vld [vmem:[%s1308_s27 + $0x78] sm:$0xff]   ;;  %1004 = vmatprep.subr.bf16.mxu0 %v1123_v5  ;;  %v1126_v11 = vld [vmem:[%s1308_s27 + $0x70] sm:$0xff]   ;;  %v1128_v14 = vld [vmem:[%s1308_s27 + $0x68] sm:$0xff]   ;;  %v475_v31 = vrot.slane %v473_v27, 1  ;;  %v603_v36 = vsel %vm600_vm1, %v601_v32, %v602_v33 }
  0x20   : > { %1005 = vmatpush3.bf16.msra.mxu0 %v1123_v5  ;;  %1024 = vmatprep.subr.bf16.mxu1 %v1124_v7  ;;  %v463_v12 = vor.u32 %v462_v8, %v458_v3  ;;  %v1129_v16 = vld [vmem:[%s1308_s27 + $0x20] sm:$0xff]   ;;  %v1131_v18 = vld [vmem:[%s1308_s27 + $0x18] sm:$0xff]   ;;  %v1133_v20 = vld [vmem:[%s1308_s27 + $0x10] sm:$0xff]   ;;  %v471_v30 = vor.u32 %v469_v26, %v467_v10  ;;  %v605_v44 = vsel %vm600_vm1, %v602_v33, %v604_v43 }
  0x21   : > { %1025 = vmatpush3.bf16.msra.mxu1 %v1124_v7  ;;  %1006 = vmatprep.subr.bf16.mxu0 %v1125_v9  ;;  %v1130_v17 = vld [vmem:[%s1308_s27 + $0x60] sm:$0xff]   ;;  %v1132_v19 = vld [vmem:[%s1308_s27 + $0x58] sm:$0xff]   ;;  %v1134_v21 = vld [vmem:[%s1308_s27 + $0x50] sm:$0xff]  }
  0x22   : > { %1026 = vmatprep.subr.bf16.mxu1 %v1126_v11  ;;  %v468_v15 = vsel %vm456_vm0, %v463_v12, %v467_v10  ;;  %v1135_v23 = vld [vmem:[%s1308_s27 + $0x8] sm:$0xff]   ;;  %v1137_v25 = vld [vmem:[%s1308_s27] sm:$0xff]   ;;  %v1141_v29 = vld [vmem:[%s1308_s27 + $0xb8] sm:$0xff]   ;;  %v476_v34 = vsel %vm456_vm0, %v471_v30, %v475_v31 }
  0x23   : > { %1040 = vmatprep.mubr.bf16.mxu1 %v468_v15  ;;  %v1136_v24 = vld [vmem:[%s1308_s27 + $0x48] sm:$0xff]   ;;  %v1138_v28 = vld [vmem:[%s1308_s27 + $0x40] sm:$0xff]   ;;  %v1143_v35 = vld [vmem:[%s1308_s27 + $0xb0] sm:$0xff]  }
  0x24   : > { %1007 = vmatpush3.bf16.msra.mxu0 %v1125_v9  ;;  %v1144_v37 = vld [vmem:[%s1308_s27 + $0xa8] sm:$0xff]   ;;  %v1145_v38 = vld [vmem:[%s1308_s27 + $0xa0] sm:$0xff]   ;;  %v1146_v39 = vld [vmem:[%s1308_s27 + $0x98] sm:$0xff]  }
  0x25   : > { %1027 = vmatpush3.bf16.msra.mxu1 %v1126_v11  ;;  %1008 = vmatprep.subr.bf16.mxu0 %v1127_v13  ;;  %v1147_v40 = vld [vmem:[%s1308_s27 + $0x90] sm:$0xff]   ;;  %v1148_v41 = vld [vmem:[%s1308_s27 + $0x88] sm:$0xff]   ;;  %v1149_v42 = vld [vmem:[%s1308_s27 + $0x80] sm:$0xff]  }
  0x26   : > { %1028 = vmatprep.subr.bf16.mxu1 %v1128_v14  ;;  %v298_v48 = vld [vmem:[#allocation2 + $0x18] sm:$0xff]  ;;  %v296_v49 = vld [vmem:[#allocation2 + $0x10] sm:$0xff]  ;;  %v299_v53 = vld [vmem:[#allocation2 + $0x8] sm:$0xff] }
  0x27   : > { %v297_v55 = vld [vmem:[#allocation2] sm:$0xff] }
  0x28   : > { %1009 = vmatpush3.bf16.msra.mxu0 %v1127_v13 }
  0x29   : > { %1029 = vmatpush3.bf16.msra.mxu1 %v1128_v14  ;;  %1010 = vmatprep.subr.bf16.mxu0 %v1129_v16 }
  0x2a   : > { %1030 = vmatprep.subr.bf16.mxu1 %v1130_v17 }
  0x2c   : > { %1011 = vmatpush3.bf16.msra.mxu0 %v1129_v16 }
  0x2d   : > { %1031 = vmatpush3.bf16.msra.mxu1 %v1130_v17  ;;  %1012 = vmatprep.subr.bf16.mxu0 %v1131_v18 }
  0x2e   : > { %1032 = vmatprep.subr.bf16.mxu1 %v1132_v19 }
  0x30   : > { %1013 = vmatpush3.bf16.msra.mxu0 %v1131_v18 }
  0x31   : > { %1033 = vmatpush3.bf16.msra.mxu1 %v1132_v19  ;;  %1014 = vmatprep.subr.bf16.mxu0 %v1133_v20 }
  0x32   : > { %1034 = vmatprep.subr.bf16.mxu1 %v1134_v21 }
  0x34   : > { %1015 = vmatpush3.bf16.msra.mxu0 %v1133_v20 }
  0x35   : > { %1035 = vmatpush3.bf16.msra.mxu1 %v1134_v21  ;;  %1016 = vmatprep.subr.bf16.mxu0 %v1135_v23 }
  0x36   : > { %1036 = vmatprep.subr.bf16.mxu1 %v1136_v24 }
  0x38   : > { %1017 = vmatpush3.bf16.msra.mxu0 %v1135_v23 }
  0x39   : > { %1037 = vmatpush3.bf16.msra.mxu1 %v1136_v24  ;;  %1018 = vmatprep.subr.bf16.mxu0 %v1137_v25 }
  0x3a   : > { %1038 = vmatprep.subr.bf16.mxu1 %v1138_v28 }
  0x3c   : > { %1019 = vmatpush3.bf16.msra.mxu0 %v1137_v25 }
  0x3d   : > { %1039 = vmatpush3.bf16.msra.mxu1 %v1138_v28  ;;  %1044 = vmatprep.subr.bf16.mxu0 %v1141_v29 }
  0x3f   : > { %1021 = vmatmul.mubr.bf16.vlgmr.msra.gmra.mxu0 %v1303_v2 }
  0x40   : > { %1045 = vmatpush3.bf16.msra.mxu0 %v1141_v29  ;;  %1041 = vmatmul.mubr.bf16.vlgmr.msra.gmra.mxu1 %v476_v34 }
  0x41   : > { %1046 = vmatprep.subr.bf16.mxu0 %v1143_v35  ;;  %1060 = vmatprep.mubr.bf16.mxu0 %v603_v36 }
  0x44   : > { %1047 = vmatpush3.bf16.msra.mxu0 %v1143_v35 }
  0x45   : > { %1048 = vmatprep.subr.bf16.mxu0 %v1144_v37 }
  0x48   : > { %1049 = vmatpush3.bf16.msra.mxu0 %v1144_v37 }
  0x49   : > { %1050 = vmatprep.subr.bf16.mxu0 %v1145_v38 }
  0x4c   : > { %1051 = vmatpush3.bf16.msra.mxu0 %v1145_v38 }
  0x4d   : > { %1052 = vmatprep.subr.bf16.mxu0 %v1146_v39 }
  0x50   : > { %1053 = vmatpush3.bf16.msra.mxu0 %v1146_v39 }
  0x51   : > { %1054 = vmatprep.subr.bf16.mxu0 %v1147_v40 }
  0x54   : > { %1055 = vmatpush3.bf16.msra.mxu0 %v1147_v40 }
  0x55   : > { %1056 = vmatprep.subr.bf16.mxu0 %v1148_v41 }
  0x58   : > { %1057 = vmatpush3.bf16.msra.mxu0 %v1148_v41 }
  0x59   : > { %1058 = vmatprep.subr.bf16.mxu0 %v1149_v42 }
  0x5c   : > { %1059 = vmatpush3.bf16.msra.mxu0 %v1149_v42 }
  0x5f   : > { %1061 = vmatmul.mubr.bf16.vlgmr.msra.gmra.mxu0 %v605_v44 }
  0xff   : > { %v1022_v45 = vpop.f32.mrf.mxu0 }
 0x100   : > { %v1042_v47 = vpop.f32.mrf.mxu1  ;;  %v431_v52 = vadd.f32 %v1022_v45, %v298_v48 }
 0x101   : > { %v414_v46 = vpop.f32.mrf.mxu0 }
 0x102   : > { %v561_v51 = vpop.f32.mrf.mxu1  ;;  %v429_v54 = vadd.f32 %v414_v46, %v296_v49  ;;  %v578_v58 = vadd.f32 %v1042_v47, %v431_v52 }
 0x103   : > { %v1023_v50 = vpop.f32.mrf.mxu0 }
 0x104   : > { %v1043_v57 = vpop.f32.mrf.mxu1  ;;  %v432_v59 = vadd.f32 %v1023_v50, %v299_v53  ;;  %v576_v61 = vadd.f32 %v561_v51, %v429_v54 }
 0x105   : > { %v417_v56 = vpop.f32.mrf.mxu0 }
 0x106   : > { %v430_v62 = vadd.f32 %v417_v56, %v297_v55  ;;  %v564_v0 = vpop.f32.mrf.mxu1  ;;  %v579_v2 = vadd.f32 %v1043_v57, %v432_v59 }
 0x108   : > { %v577_v5 = vadd.f32 %v564_v0, %v430_v62 }
 0x11f   : > { %v1062_v60 = vpop.f32.mrf.mxu0 }
 0x120   : > { %v707_v63 = vadd.f32 %v1062_v60, %v578_v58 }
 0x121   : > { %v690_v1 = vpop.f32.mrf.mxu0 }
 0x122   : > { %711 = vst [vmem:[#allocation2 + $0x18] sm:$0xff] %v707_v63  ;;  %v705_v3 = vadd.f32 %v690_v1, %v576_v61 }
 0x123   : > { %v1063_v4 = vpop.f32.mrf.mxu0 }
 0x124   : > { %709 = vst [vmem:[#allocation2 + $0x10] sm:$0xff] %v705_v3  ;;  %v708_v6 = vadd.f32 %v1063_v4, %v579_v2  ;;  %716 = sbr.rel (%p960_p10) target bundleno = 311 (0x137), region = 44 }
 0x125   : > { %v693_v7 = vpop.f32.mrf.mxu0 }
 0x126   : > { %712 = vst [vmem:[#allocation2 + $0x8] sm:$0xff] %v708_v6  ;;  %v706_v8 = vadd.f32 %v693_v7, %v577_v5 }
 0x128   : > { %710 = vst [vmem:[#allocation2] sm:$0xff] %v706_v8 }
 0x129   : > { %v961_v10 = vld [vmem:[%s1381_s3] ss:$0 sm:$0xff]  ;;  %v719_v16 = vld [vmem:[#allocation2 + $0x18] sm:$0xff]  ;;  %v973_v17 = vld [vmem:[%s1290_s14 + $0x8] sm:$0xff]  }
 0x12a   : > { %v966_v11 = vld [vmem:[%s1290_s14] sm:$0xff]   ;;  %v730_v19 = vadd.f32 %v961_v10, %v719_v16  ;;  %v971_v20 = vunpack.c.l.bf16 %v973_v17  ;;  %v972_v22 = vunpack.c.h.bf16 %v973_v17 }
 0x12b   : > { %v717_v9 = vld [vmem:[#allocation2 + $0x10] sm:$0xff]  ;;  %v967_v13 = vunpack.c.l.bf16 %v966_v11  ;;  %v968_v15 = vunpack.c.h.bf16 %v966_v11 }
 0x12c   : > { %v728_v12 = vadd.f32 %v961_v10, %v717_v9  ;;  %v742_v26 = vadd.f32 %v971_v20, %v730_v19 }
 0x12d   : > { %v720_v21 = vld [vmem:[#allocation2 + $0x8] sm:$0xff] }
 0x12e   : > { %v740_v23 = vadd.f32 %v967_v13, %v728_v12  ;;  %v731_v24 = vadd.f32 %v961_v10, %v720_v21  ;;  %v746_v30 = vmax.f32 %v742_v26, 0.0 }
 0x12f   : > { %v718_v14 = vld [vmem:[#allocation2] sm:$0xff] }
 0x130   : > { %v729_v18 = vadd.f32 %v961_v10, %v718_v14  ;;  %v744_v27 = vmax.f32 %v740_v23, 0.0  ;;  %v743_v28 = vadd.f32 %v972_v22, %v731_v24  ;;  %750 = vst [vmem:[%s1295_s17 + $0x10] sm:$0xff] %v746_v30 }
 0x132   : > { %v741_v25 = vadd.f32 %v968_v15, %v729_v18  ;;  %748 = vst [vmem:[%s1295_s17] sm:$0xff] %v744_v27  ;;  %v747_v31 = vmax.f32 %v743_v28, 0.0 }
 0x134   : > { %v745_v29 = vmax.f32 %v741_v25, 0.0  ;;  %751 = vst [vmem:[%s1295_s17 + $0x18] sm:$0xff] %v747_v31 }
 0x136   : > { %749 = vst [vmem:[%s1295_s17 + $0x8] sm:$0xff] %v745_v29 }
 0x137 PF: > { %s14_s21 = sadd.s32 1, %s1204_s21   ;;  %s1384_s30 = sld [smem:[#allocation3_spill]] }
 0x138   : > { %p11_p11 = scmp.ge.s32.totalorder %s14_s21, 194   ;;  %s1385_s15 = smov %s1192_s18 }
 0x139   : > { %s1386_s16 = smov %s1196_s19  ;;  %s1387_s17 = smov %s1200_s20 }
 0x13a   : > { %s1388_s18 = smov %s1392_s22  ;;  %s1389_s19 = smov %s1396_s23 }
 0x13b   :  { %13 = sbr.rel (!%p11_p11) target bundleno = 4 (0x4), region = 80 }
 0x13d   : > { %s1390_s20 = smov %s1384_s30 }

</bundles_post_ra>
